<compile_context>
chip_gen: v5e
topology: v5e:2x2
jax: 0.10.0
libtpu: 0.0.40
codegen_flags: <defaults>
</compile_context>

<pallas_src>
import math

import jax
import jax.numpy as jnp
from jax.experimental import pallas as pl
from jax.experimental.pallas import tpu as pltpu


# --------------------------- fused LSTM + head kernel ---------------------------

def _make_kernel(n_layers):
    has_upper = n_layers > 1

    def kernel(*refs):
        it = iter(refs)
        x_ref = next(it)            # (T*B, Din)           bf16, time-major rows (t, b)
        hc0_ref = next(it)          # (2, L, B, H)          f32  [h0; c0]
        wih0_ref = next(it)         # (Din, 4H)             bf16, g-cols pre-scaled x2
        whh0_ref = next(it)         # (H, 4H)               bf16, g-cols pre-scaled x2
        wf_ref = next(it) if has_upper else None   # (L-1, 2H, 4H) bf16, g-cols x2
        ball_ref = next(it)         # (L, 1, 4H)            f32, g-cols pre-scaled x2
        wout_ref = next(it)         # (H, C)                bf16
        bout_ref = next(it)         # (1, C)                f32
        logits_ref = next(it)       # (T*B, C)              out
        hcT_ref = next(it)          # (2, L, B, H)          out
        gx_ref = next(it)           # (T*B, 4H) f32         scratch: layer-0 x-projection
        hid_ref = next(it)          # (T*B, H)  f32         scratch: top-layer hiddens

        B = hc0_ref.shape[2]
        H = hc0_ref.shape[3]
        T = x_ref.shape[0] // B

        # --- (1) layer-0 input projection for ALL timesteps: one big matmul ---
        gx_ref[...] = (jnp.dot(x_ref[...], wih0_ref[...],
                               preferred_element_type=jnp.float32)
                       + ball_ref[0])

        # --- loop-invariant values (hoisted: JAX does not CSE broadcasts) ---
        lane = jax.lax.broadcasted_iota(jnp.int32, (B, 4 * H), 1)
        is_g = (lane >= 2 * H) & (lane < 3 * H)        # g gate lives in lanes [2H, 3H)
        whh0 = whh0_ref[...]
        w_up = [wf_ref[l] for l in range(n_layers - 1)] if has_upper else []
        b_up = [ball_ref[l] for l in range(1, n_layers)]

        def activate(gates):
            # g columns were pre-scaled by 2 => tanh(x) = 2*sigmoid(2x) - 1,
            # so ONE EUP sigmoid pass over the whole (B, 4H) tile + a VPU fix-up.
            a = jax.nn.sigmoid(gates)
            return jnp.where(is_g, 2.0 * a - 1.0, a)

        def cell_update(gates, c_prev):
            a = activate(gates)
            i_g = a[:, 0 * H:1 * H]
            f_g = a[:, 1 * H:2 * H]
            g_g = a[:, 2 * H:3 * H]
            o_g = a[:, 3 * H:4 * H]
            c_new = f_g * c_prev + i_g * g_g
            h_new = o_g * jnp.tanh(c_new)
            return h_new, c_new

        def body(t, carry):
            hs, cs = carry
            row = t * B
            # layer 0: x-projection (incl. bias) precomputed; only the recurrent
            # matmul is left on the serial chain.
            gates = gx_ref[pl.ds(row, B), :] + jnp.dot(
                hs[0].astype(whh0.dtype), whh0,
                preferred_element_type=jnp.float32)
            h_new, c_new = cell_update(gates, cs[0])
            new_hs = [h_new]
            new_cs = [c_new]
            # layers >= 1: single fused matmul on [h_below, h_prev] @ [W_ih; W_hh]
            for l in range(1, n_layers):
                op = jnp.concatenate([new_hs[-1], hs[l]],
                                     axis=1).astype(w_up[l - 1].dtype)
                gates = (jnp.dot(op, w_up[l - 1],
                                 preferred_element_type=jnp.float32)
                         + b_up[l - 1])
                h_new, c_new = cell_update(gates, cs[l])
                new_hs.append(h_new)
                new_cs.append(c_new)
            # stash top-layer hidden for the fused head (store is off the
            # recurrent dependence chain, so its latency hides under step t+1).
            hid_ref[pl.ds(row, B), :] = new_hs[-1]
            return tuple(new_hs), tuple(new_cs)

        init_h = tuple(hc0_ref[0, l] for l in range(n_layers))
        init_c = tuple(hc0_ref[1, l] for l in range(n_layers))
        hs, cs = jax.lax.fori_loop(0, T, body, (init_h, init_c),
                                   unroll=min(8, T))

        for l in range(n_layers):
            hcT_ref[0, l] = hs[l]
            hcT_ref[1, l] = cs[l]

        # --- (2) fused output head: ONE matmul over all T*B rows, ONE store ---
        logits = (jnp.dot(hid_ref[...].astype(wout_ref.dtype), wout_ref[...],
                          preferred_element_type=jnp.float32)
                  + bout_ref[...])
        logits_ref[...] = logits.astype(logits_ref.dtype)

    return kernel


def _full_spec(shape):
    nd = len(shape)
    return pl.BlockSpec(tuple(shape), lambda i, nd=nd: (0,) * nd)


def lstm_forward(kparams, x, states):
    """x: (B, T, char_length). Returns (logits (B*T, char_length), (h_n, c_n))."""
    B, T, Din = x.shape
    h0, c0 = states                                 # (L, B, H) each
    L, _, H = h0.shape
    Cout = kparams["w_out"].shape[1]

    # tiny wrapper-side relayouts only
    x2d = jnp.transpose(x, (1, 0, 2)).reshape(T * B, Din).astype(jnp.bfloat16)
    hc0 = jnp.stack([h0, c0])                       # (2, L, B, H)

    in_arrays = [x2d, hc0, kparams["w_ih0"], kparams["w_hh0"]]
    if L > 1:
        in_arrays.append(kparams["w_fused"])
    in_arrays += [kparams["b_all"], kparams["w_out"], kparams["b_out"]]

    out_shape = (
        jax.ShapeDtypeStruct((T * B, Cout), x.dtype),   # logits, rows ordered (t, b)
        jax.ShapeDtypeStruct((2, L, B, H), h0.dtype),   # packed [h_n; c_n]
    )

    logits_tm, hcT = pl.pallas_call(
        _make_kernel(L),
        out_shape=out_shape,
        grid=(1,),
        in_specs=[_full_spec(a.shape) for a in in_arrays],
        out_specs=(_full_spec((T * B, Cout)), _full_spec((2, L, B, H))),
        scratch_shapes=[
            pltpu.VMEM((T * B, 4 * H), jnp.float32),    # layer-0 x-projection
            pltpu.VMEM((T * B, H), jnp.float32),        # top-layer hiddens
        ],
        compiler_params=pltpu.CompilerParams(
            dimension_semantics=("arbitrary",),
            vmem_limit_bytes=32 * 1024 * 1024),
    )(*in_arrays)

    # out.contiguous().view(-1, hidden) with batch_first => rows ordered (b, t).
    logits = logits_tm.reshape(T, B, Cout).transpose(1, 0, 2).reshape(B * T, Cout)
    return logits, (hcT[0], hcT[1])


# ------------------------------ params / reference ------------------------------

def init_params(key, char_length, hidden_size, n_layers):
    """Same shapes / init range as PyTorch nn.LSTM + nn.Linear defaults."""
    k = 1.0 / math.sqrt(hidden_size)
    params = {"lstm": []}
    for layer in range(n_layers):
        in_dim = char_length if layer == 0 else hidden_size
        key, k1, k2, k3, k4 = jax.random.split(key, 5)
        w_ih = jax.random.uniform(k1, (4 * hidden_size, in_dim), jnp.float32, -k, k)
        w_hh = jax.random.uniform(k2, (4 * hidden_size, hidden_size), jnp.float32, -k, k)
        b_ih = jax.random.uniform(k3, (4 * hidden_size,), jnp.float32, -k, k)
        b_hh = jax.random.uniform(k4, (4 * hidden_size,), jnp.float32, -k, k)
        params["lstm"].append({
            "w_ih_t": w_ih.T,                      # (Din, 4H)
            "w_hh_t": w_hh.T,                      # (H, 4H)
            "bias": (b_ih + b_hh).reshape(1, -1),  # (1, 4H)
        })
    key, k1, k2 = jax.random.split(key, 3)
    w_out = jax.random.uniform(k1, (char_length, hidden_size), jnp.float32, -k, k)
    b_out = jax.random.uniform(k2, (char_length,), jnp.float32, -k, k)
    params["output"] = {"w_t": w_out.T, "b": b_out.reshape(1, -1)}
    return params


def prepare_kernel_params(params):
    """One-time (init-time) transform of the plain params into kernel operands:
    g-gate columns pre-scaled by 2 (tanh-via-sigmoid trick), upper-layer
    [W_ih; W_hh] fused, biases stacked, MXU operands cast to bf16."""
    L = len(params["lstm"])

    def gscale(w):
        H = w.shape[-1] // 4
        return w.at[..., 2 * H:3 * H].multiply(2.0)

    w_ih0 = gscale(params["lstm"][0]["w_ih_t"]).astype(jnp.bfloat16)   # (Din, 4H)
    w_hh0 = gscale(params["lstm"][0]["w_hh_t"]).astype(jnp.bfloat16)   # (H, 4H)
    b_all = jnp.stack([gscale(params["lstm"][l]["bias"])
                       for l in range(L)])                             # (L, 1, 4H) f32
    if L > 1:
        w_fused = jnp.stack([
            jnp.concatenate([gscale(params["lstm"][l]["w_ih_t"]),
                             gscale(params["lstm"][l]["w_hh_t"])], axis=0)
            for l in range(1, L)]).astype(jnp.bfloat16)                # (L-1, 2H, 4H)
    else:
        w_fused = None
    return {
        "w_ih0": w_ih0,
        "w_hh0": w_hh0,
        "w_fused": w_fused,
        "b_all": b_all,
        "w_out": params["output"]["w_t"].astype(jnp.bfloat16),         # (H, C)
        "b_out": params["output"]["b"],                                # (1, C) f32
    }


def init_states(n_layers, batch_size, hidden_size):
    h = jnp.zeros((n_layers, batch_size, hidden_size), jnp.float32)
    c = jnp.zeros((n_layers, batch_size, hidden_size), jnp.float32)
    return (h, c)


def _ref_forward(params, x, states):
    """Pure-JAX f32 reference matching PyTorch LSTM semantics (for verification)."""
    B, T, C = x.shape
    h_all, c_all = states
    L, _, H = h_all.shape
    hs = [h_all[l] for l in range(L)]
    cs = [c_all[l] for l in range(L)]
    outs = []
    for t in range(T):
        inp = x[:, t, :]
        for l in range(L):
            p = params["lstm"][l]
            g = inp @ p["w_ih_t"] + hs[l] @ p["w_hh_t"] + p["bias"]
            i = jax.nn.sigmoid(g[:, 0 * H:1 * H])
            f = jax.nn.sigmoid(g[:, 1 * H:2 * H])
            gg = jnp.tanh(g[:, 2 * H:3 * H])
            o = jax.nn.sigmoid(g[:, 3 * H:4 * H])
            cs[l] = f * cs[l] + i * gg
            hs[l] = o * jnp.tanh(cs[l])
            inp = hs[l]
        outs.append(inp)
    out = jnp.stack(outs, axis=1).reshape(B * T, H)
    logits = out @ params["output"]["w_t"] + params["output"]["b"]
    return logits, (jnp.stack(hs), jnp.stack(cs))


# ------------------------------------ main ------------------------------------

if __name__ == "__main__":
    char_length = 16
    hidden_size = 32
    n_layers = 2
    batch = 2
    seq = 8

    key = jax.random.PRNGKey(0)
    key, pkey, xkey = jax.random.split(key, 3)

    params = init_params(pkey, char_length, hidden_size, n_layers)
    kparams = prepare_kernel_params(params)
    x = jax.random.normal(xkey, (batch, seq, char_length), jnp.float32)
    states = init_states(n_layers, batch, hidden_size)

    fwd = jax.jit(lstm_forward)
    logits, (h_n, c_n) = fwd(kparams, x, states)
    jax.block_until_ready((logits, h_n, c_n))

    assert logits.shape == (batch * seq, char_length)
    assert h_n.shape == (n_layers, batch, hidden_size)
    assert c_n.shape == (n_layers, batch, hidden_size)

    # numerical sanity check against the pure-JAX f32 reference.
    # Kernel uses bf16 MXU operands (f32 accumulation / f32 state carry), so the
    # tolerance is set accordingly.
    ref_logits, (ref_h, ref_c) = _ref_forward(params, x, states)
    assert jnp.allclose(logits, ref_logits, atol=2e-2, rtol=2e-2)
    assert jnp.allclose(h_n, ref_h, atol=2e-2, rtol=2e-2)
    assert jnp.allclose(c_n, ref_c, atol=2e-2, rtol=2e-2)

    print("KERNEL_OK")
</pallas_src>

<mosaic_0001>
module attributes {stable_mosaic.version = 11 : i64} {
  func.func @kernel(%arg0: i32, %arg1: memref<16x16xbf16, #tpu.memory_space<vmem>>, %arg2: memref<2x2x2x32xf32, #tpu.memory_space<vmem>>, %arg3: memref<16x128xbf16, #tpu.memory_space<vmem>>, %arg4: memref<32x128xbf16, #tpu.memory_space<vmem>>, %arg5: memref<1x64x128xbf16, #tpu.memory_space<vmem>>, %arg6: memref<2x1x128xf32, #tpu.memory_space<vmem>>, %arg7: memref<32x16xbf16, #tpu.memory_space<vmem>>, %arg8: memref<1x16xf32, #tpu.memory_space<vmem>>, %arg9: memref<16x16xf32, #tpu.memory_space<vmem>>, %arg10: memref<2x2x2x32xf32, #tpu.memory_space<vmem>>, %arg11: memref<16x128xf32, #tpu.memory_space<vmem>>, %arg12: memref<16x32xf32, #tpu.memory_space<vmem>>) attributes {dimension_semantics = [#tpu.dimension_semantics<arbitrary>], iteration_bounds = array<i64: 1>, scalar_prefetch = 0 : i64, scratch_operands = 2 : i64, tpu.core_type = #tpu.core_type<tc>, window_params = [{pipeline_mode = #tpu.pipeline_mode<synchronous>, transform_indices = @transform_0, window_bounds = array<i64: 16, 16>}, {pipeline_mode = #tpu.pipeline_mode<synchronous>, transform_indices = @transform_1, window_bounds = array<i64: 2, 2, 2, 32>}, {pipeline_mode = #tpu.pipeline_mode<synchronous>, transform_indices = @transform_2, window_bounds = array<i64: 16, 128>}, {pipeline_mode = #tpu.pipeline_mode<synchronous>, transform_indices = @transform_3, window_bounds = array<i64: 32, 128>}, {pipeline_mode = #tpu.pipeline_mode<synchronous>, transform_indices = @transform_4, window_bounds = array<i64: 1, 64, 128>}, {pipeline_mode = #tpu.pipeline_mode<synchronous>, transform_indices = @transform_5, window_bounds = array<i64: 2, 1, 128>}, {pipeline_mode = #tpu.pipeline_mode<synchronous>, transform_indices = @transform_6, window_bounds = array<i64: 32, 16>}, {pipeline_mode = #tpu.pipeline_mode<synchronous>, transform_indices = @transform_7, window_bounds = array<i64: 1, 16>}, {pipeline_mode = #tpu.pipeline_mode<synchronous>, transform_indices = @transform_8, window_bounds = array<i64: 16, 16>}, {pipeline_mode = #tpu.pipeline_mode<synchronous>, transform_indices = @transform_9, window_bounds = array<i64: 2, 2, 2, 32>}]} {
    %c0 = arith.constant 0 : index
    %c0_0 = arith.constant 0 : index
    %0 = vector.load %arg1[%c0, %c0_0] : memref<16x16xbf16, #tpu.memory_space<vmem>>, vector<16x16xbf16>
    %c0_1 = arith.constant 0 : index
    %c0_2 = arith.constant 0 : index
    %1 = vector.load %arg3[%c0_1, %c0_2] : memref<16x128xbf16, #tpu.memory_space<vmem>>, vector<16x128xbf16>
    %cst = arith.constant dense<0.000000e+00> : vector<16x128xf32>
    %2 = tpu.matmul %0, %1, %cst {dimension_numbers = #tpu.dot_dimension_numbers<[1], [0], [0], [1], [0, 0, 1, 1], [], []>} : vector<16x16xbf16>, vector<16x128xbf16>, vector<16x128xf32> -> vector<16x128xf32>
    %c0_3 = arith.constant 0 : index
    %c0_4 = arith.constant 0 : index
    %c0_5 = arith.constant 0 : index
    %3 = vector.load %arg6[%c0_3, %c0_4, %c0_5] : memref<2x1x128xf32, #tpu.memory_space<vmem>>, vector<1x1x128xf32>
    %4 = vector.shape_cast %3 : vector<1x1x128xf32> to vector<1x128xf32>
    %5 = vector.broadcast %4 : vector<1x128xf32> to vector<16x128xf32>
    %6 = arith.addf %2, %5 : vector<16x128xf32>
    %c0_6 = arith.constant 0 : index
    %c0_7 = arith.constant 0 : index
    %7 = vector.load %arg11[%c0_6, %c0_7] : memref<16x128xf32, #tpu.memory_space<vmem>>, vector<16x128xf32>
    tpu.vector_store %arg11[%c0_6, %c0_7], %6 {strides = array<i32>} : memref<16x128xf32, #tpu.memory_space<vmem>>, vector<16x128xf32>,
    %8 = tpu.iota {dimensions = array<i32: 1>} : vector<2x128xi32>
    %c64_i32 = arith.constant 64 : i32
    %9 = vector.broadcast %c64_i32 : i32 to vector<2x128xi32>
    %10 = arith.cmpi sge, %8, %9 : vector<2x128xi32>
    %c96_i32 = arith.constant 96 : i32
    %11 = vector.broadcast %c96_i32 : i32 to vector<2x128xi32>
    %12 = arith.cmpi slt, %8, %11 : vector<2x128xi32>
    %13 = arith.andi %10, %12 : vector<2x128xi1>
    %c0_8 = arith.constant 0 : index
    %c0_9 = arith.constant 0 : index
    %14 = vector.load %arg4[%c0_8, %c0_9] : memref<32x128xbf16, #tpu.memory_space<vmem>>, vector<32x128xbf16>
    %c0_10 = arith.constant 0 : index
    %c0_11 = arith.constant 0 : index
    %c0_12 = arith.constant 0 : index
    %15 = vector.load %arg5[%c0_10, %c0_11, %c0_12] : memref<1x64x128xbf16, #tpu.memory_space<vmem>>, vector<1x64x128xbf16>
    %16 = vector.shape_cast %15 : vector<1x64x128xbf16> to vector<64x128xbf16>
    %c1 = arith.constant 1 : index
    %c0_13 = arith.constant 0 : index
    %c0_14 = arith.constant 0 : index
    %17 = vector.load %arg6[%c1, %c0_13, %c0_14] : memref<2x1x128xf32, #tpu.memory_space<vmem>>, vector<1x1x128xf32>
    %18 = vector.shape_cast %17 : vector<1x1x128xf32> to vector<1x128xf32>
    %c0_15 = arith.constant 0 : index
    %c0_16 = arith.constant 0 : index
    %c0_17 = arith.constant 0 : index
    %c0_18 = arith.constant 0 : index
    %19 = vector.load %arg2[%c0_15, %c0_16, %c0_17, %c0_18] : memref<2x2x2x32xf32, #tpu.memory_space<vmem>>, vector<1x1x2x32xf32>
    %20 = vector.shape_cast %19 : vector<1x1x2x32xf32> to vector<2x32xf32>
    %c0_19 = arith.constant 0 : index
    %c1_20 = arith.constant 1 : index
    %c0_21 = arith.constant 0 : index
    %c0_22 = arith.constant 0 : index
    %21 = vector.load %arg2[%c0_19, %c1_20, %c0_21, %c0_22] : memref<2x2x2x32xf32, #tpu.memory_space<vmem>>, vector<1x1x2x32xf32>
    %22 = vector.shape_cast %21 : vector<1x1x2x32xf32> to vector<2x32xf32>
    %c1_23 = arith.constant 1 : index
    %c0_24 = arith.constant 0 : index
    %c0_25 = arith.constant 0 : index
    %c0_26 = arith.constant 0 : index
    %23 = vector.load %arg2[%c1_23, %c0_24, %c0_25, %c0_26] : memref<2x2x2x32xf32, #tpu.memory_space<vmem>>, vector<1x1x2x32xf32>
    %24 = vector.shape_cast %23 : vector<1x1x2x32xf32> to vector<2x32xf32>
    %c1_27 = arith.constant 1 : index
    %c1_28 = arith.constant 1 : index
    %c0_29 = arith.constant 0 : index
    %c0_30 = arith.constant 0 : index
    %25 = vector.load %arg2[%c1_27, %c1_28, %c0_29, %c0_30] : memref<2x2x2x32xf32, #tpu.memory_space<vmem>>, vector<1x1x2x32xf32>
    %26 = vector.shape_cast %25 : vector<1x1x2x32xf32> to vector<2x32xf32>
    %c0_i32 = arith.constant 0 : i32
    %c2_i32 = arith.constant 2 : i32
    %27 = arith.muli %c0_i32, %c2_i32 : i32
    %28 = arith.index_cast %27 : i32 to index
    %c0_31 = arith.constant 0 : index
    %29 = vector.load %arg11[%28, %c0_31] : memref<16x128xf32, #tpu.memory_space<vmem>>, vector<2x128xf32>
    %30 = arith.truncf %20 : vector<2x32xf32> to vector<2x32xbf16>
    %cst_32 = arith.constant dense<0.000000e+00> : vector<2x128xf32>
    %31 = tpu.matmul %30, %14, %cst_32 {dimension_numbers = #tpu.dot_dimension_numbers<[1], [0], [0], [1], [0, 0, 1, 1], [], []>} : vector<2x32xbf16>, vector<32x128xbf16>, vector<2x128xf32> -> vector<2x128xf32>
    %32 = arith.addf %29, %31 : vector<2x128xf32>
    %33 = arith.negf %32 : vector<2x128xf32>
    %34 = math.exp %33 : vector<2x128xf32>
    %cst_33 = arith.constant 1.000000e+00 : f32
    %35 = vector.broadcast %cst_33 : f32 to vector<2x128xf32>
    %36 = arith.addf %35, %34 : vector<2x128xf32>
    %37 = arith.divf %35, %36 : vector<2x128xf32>
    %cst_34 = arith.constant 2.000000e+00 : f32
    %38 = vector.broadcast %cst_34 : f32 to vector<2x128xf32>
    %39 = arith.mulf %38, %37 : vector<2x128xf32>
    %cst_35 = arith.constant 1.000000e+00 : f32
    %40 = vector.broadcast %cst_35 : f32 to vector<2x128xf32>
    %41 = arith.subf %39, %40 : vector<2x128xf32>
    %42 = arith.select %13, %41, %37 : vector<2x128xi1>, vector<2x128xf32>
    %43 = vector.extract_strided_slice %42 {offsets = [0, 0], sizes = [2, 32], strides = [1, 1]} : vector<2x128xf32> to vector<2x32xf32>
    %44 = vector.extract_strided_slice %42 {offsets = [0, 32], sizes = [2, 32], strides = [1, 1]} : vector<2x128xf32> to vector<2x32xf32>
    %45 = vector.extract_strided_slice %42 {offsets = [0, 64], sizes = [2, 32], strides = [1, 1]} : vector<2x128xf32> to vector<2x32xf32>
    %46 = vector.extract_strided_slice %42 {offsets = [0, 96], sizes = [2, 32], strides = [1, 1]} : vector<2x128xf32> to vector<2x32xf32>
    %47 = arith.mulf %44, %24 : vector<2x32xf32>
    %48 = arith.mulf %43, %45 : vector<2x32xf32>
    %49 = arith.addf %47, %48 : vector<2x32xf32>
    %50 = math.tanh %49 : vector<2x32xf32>
    %51 = arith.mulf %46, %50 : vector<2x32xf32>
    %52 = tpu.concatenate %51, %22 in 1 : vector<2x32xf32>, vector<2x32xf32> -> vector<2x64xf32>
    %53 = arith.truncf %52 : vector<2x64xf32> to vector<2x64xbf16>
    %cst_36 = arith.constant dense<0.000000e+00> : vector<2x128xf32>
    %54 = tpu.matmul %53, %16, %cst_36 {dimension_numbers = #tpu.dot_dimension_numbers<[1], [0], [0], [1], [0, 0, 1, 1], [], []>} : vector<2x64xbf16>, vector<64x128xbf16>, vector<2x128xf32> -> vector<2x128xf32>
    %55 = vector.broadcast %18 : vector<1x128xf32> to vector<2x128xf32>
    %56 = arith.addf %54, %55 : vector<2x128xf32>
    %57 = arith.negf %56 : vector<2x128xf32>
    %58 = math.exp %57 : vector<2x128xf32>
    %cst_37 = arith.constant 1.000000e+00 : f32
    %59 = vector.broadcast %cst_37 : f32 to vector<2x128xf32>
    %60 = arith.addf %59, %58 : vector<2x128xf32>
    %61 = arith.divf %59, %60 : vector<2x128xf32>
    %cst_38 = arith.constant 2.000000e+00 : f32
    %62 = vector.broadcast %cst_38 : f32 to vector<2x128xf32>
    %63 = arith.mulf %62, %61 : vector<2x128xf32>
    %cst_39 = arith.constant 1.000000e+00 : f32
    %64 = vector.broadcast %cst_39 : f32 to vector<2x128xf32>
    %65 = arith.subf %63, %64 : vector<2x128xf32>
    %66 = arith.select %13, %65, %61 : vector<2x128xi1>, vector<2x128xf32>
    %67 = vector.extract_strided_slice %66 {offsets = [0, 0], sizes = [2, 32], strides = [1, 1]} : vector<2x128xf32> to vector<2x32xf32>
    %68 = vector.extract_strided_slice %66 {offsets = [0, 32], sizes = [2, 32], strides = [1, 1]} : vector<2x128xf32> to vector<2x32xf32>
    %69 = vector.extract_strided_slice %66 {offsets = [0, 64], sizes = [2, 32], strides = [1, 1]} : vector<2x128xf32> to vector<2x32xf32>
    %70 = vector.extract_strided_slice %66 {offsets = [0, 96], sizes = [2, 32], strides = [1, 1]} : vector<2x128xf32> to vector<2x32xf32>
    %71 = arith.mulf %68, %26 : vector<2x32xf32>
    %72 = arith.mulf %67, %69 : vector<2x32xf32>
    %73 = arith.addf %71, %72 : vector<2x32xf32>
    %74 = math.tanh %73 : vector<2x32xf32>
    %75 = arith.mulf %70, %74 : vector<2x32xf32>
    %76 = arith.index_cast %27 : i32 to index
    %c0_40 = arith.constant 0 : index
    %77 = vector.load %arg12[%76, %c0_40] : memref<16x32xf32, #tpu.memory_space<vmem>>, vector<2x32xf32>
    tpu.vector_store %arg12[%76, %c0_40], %75 {strides = array<i32>} : memref<16x32xf32, #tpu.memory_space<vmem>>, vector<2x32xf32>,
    %c1_i32 = arith.constant 1 : i32
    %c2_i32_41 = arith.constant 2 : i32
    %78 = arith.muli %c1_i32, %c2_i32_41 : i32
    %79 = arith.index_cast %78 : i32 to index
    %c0_42 = arith.constant 0 : index
    %80 = vector.load %arg11[%79, %c0_42] : memref<16x128xf32, #tpu.memory_space<vmem>>, vector<2x128xf32>
    %81 = arith.truncf %51 : vector<2x32xf32> to vector<2x32xbf16>
    %cst_43 = arith.constant dense<0.000000e+00> : vector<2x128xf32>
    %82 = tpu.matmul %81, %14, %cst_43 {dimension_numbers = #tpu.dot_dimension_numbers<[1], [0], [0], [1], [0, 0, 1, 1], [], []>} : vector<2x32xbf16>, vector<32x128xbf16>, vector<2x128xf32> -> vector<2x128xf32>
    %83 = arith.addf %80, %82 : vector<2x128xf32>
    %84 = arith.negf %83 : vector<2x128xf32>
    %85 = math.exp %84 : vector<2x128xf32>
    %cst_44 = arith.constant 1.000000e+00 : f32
    %86 = vector.broadcast %cst_44 : f32 to vector<2x128xf32>
    %87 = arith.addf %86, %85 : vector<2x128xf32>
    %88 = arith.divf %86, %87 : vector<2x128xf32>
    %cst_45 = arith.constant 2.000000e+00 : f32
    %89 = vector.broadcast %cst_45 : f32 to vector<2x128xf32>
    %90 = arith.mulf %89, %88 : vector<2x128xf32>
    %cst_46 = arith.constant 1.000000e+00 : f32
    %91 = vector.broadcast %cst_46 : f32 to vector<2x128xf32>
    %92 = arith.subf %90, %91 : vector<2x128xf32>
    %93 = arith.select %13, %92, %88 : vector<2x128xi1>, vector<2x128xf32>
    %94 = vector.extract_strided_slice %93 {offsets = [0, 0], sizes = [2, 32], strides = [1, 1]} : vector<2x128xf32> to vector<2x32xf32>
    %95 = vector.extract_strided_slice %93 {offsets = [0, 32], sizes = [2, 32], strides = [1, 1]} : vector<2x128xf32> to vector<2x32xf32>
    %96 = vector.extract_strided_slice %93 {offsets = [0, 64], sizes = [2, 32], strides = [1, 1]} : vector<2x128xf32> to vector<2x32xf32>
    %97 = vector.extract_strided_slice %93 {offsets = [0, 96], sizes = [2, 32], strides = [1, 1]} : vector<2x128xf32> to vector<2x32xf32>
    %98 = arith.mulf %95, %49 : vector<2x32xf32>
    %99 = arith.mulf %94, %96 : vector<2x32xf32>
    %100 = arith.addf %98, %99 : vector<2x32xf32>
    %101 = math.tanh %100 : vector<2x32xf32>
    %102 = arith.mulf %97, %101 : vector<2x32xf32>
    %103 = tpu.concatenate %102, %75 in 1 : vector<2x32xf32>, vector<2x32xf32> -> vector<2x64xf32>
    %104 = arith.truncf %103 : vector<2x64xf32> to vector<2x64xbf16>
    %cst_47 = arith.constant dense<0.000000e+00> : vector<2x128xf32>
    %105 = tpu.matmul %104, %16, %cst_47 {dimension_numbers = #tpu.dot_dimension_numbers<[1], [0], [0], [1], [0, 0, 1, 1], [], []>} : vector<2x64xbf16>, vector<64x128xbf16>, vector<2x128xf32> -> vector<2x128xf32>
    %106 = vector.broadcast %18 : vector<1x128xf32> to vector<2x128xf32>
    %107 = arith.addf %105, %106 : vector<2x128xf32>
    %108 = arith.negf %107 : vector<2x128xf32>
    %109 = math.exp %108 : vector<2x128xf32>
    %cst_48 = arith.constant 1.000000e+00 : f32
    %110 = vector.broadcast %cst_48 : f32 to vector<2x128xf32>
    %111 = arith.addf %110, %109 : vector<2x128xf32>
    %112 = arith.divf %110, %111 : vector<2x128xf32>
    %cst_49 = arith.constant 2.000000e+00 : f32
    %113 = vector.broadcast %cst_49 : f32 to vector<2x128xf32>
    %114 = arith.mulf %113, %112 : vector<2x128xf32>
    %cst_50 = arith.constant 1.000000e+00 : f32
    %115 = vector.broadcast %cst_50 : f32 to vector<2x128xf32>
    %116 = arith.subf %114, %115 : vector<2x128xf32>
    %117 = arith.select %13, %116, %112 : vector<2x128xi1>, vector<2x128xf32>
    %118 = vector.extract_strided_slice %117 {offsets = [0, 0], sizes = [2, 32], strides = [1, 1]} : vector<2x128xf32> to vector<2x32xf32>
    %119 = vector.extract_strided_slice %117 {offsets = [0, 32], sizes = [2, 32], strides = [1, 1]} : vector<2x128xf32> to vector<2x32xf32>
    %120 = vector.extract_strided_slice %117 {offsets = [0, 64], sizes = [2, 32], strides = [1, 1]} : vector<2x128xf32> to vector<2x32xf32>
    %121 = vector.extract_strided_slice %117 {offsets = [0, 96], sizes = [2, 32], strides = [1, 1]} : vector<2x128xf32> to vector<2x32xf32>
    %122 = arith.mulf %119, %73 : vector<2x32xf32>
    %123 = arith.mulf %118, %120 : vector<2x32xf32>
    %124 = arith.addf %122, %123 : vector<2x32xf32>
    %125 = math.tanh %124 : vector<2x32xf32>
    %126 = arith.mulf %121, %125 : vector<2x32xf32>
    %127 = arith.index_cast %78 : i32 to index
    %c0_51 = arith.constant 0 : index
    %128 = vector.load %arg12[%127, %c0_51] : memref<16x32xf32, #tpu.memory_space<vmem>>, vector<2x32xf32>
    tpu.vector_store %arg12[%127, %c0_51], %126 {strides = array<i32>} : memref<16x32xf32, #tpu.memory_space<vmem>>, vector<2x32xf32>,
    %c2_i32_52 = arith.constant 2 : i32
    %c2_i32_53 = arith.constant 2 : i32
    %129 = arith.muli %c2_i32_52, %c2_i32_53 : i32
    %130 = arith.index_cast %129 : i32 to index
    %c0_54 = arith.constant 0 : index
    %131 = vector.load %arg11[%130, %c0_54] : memref<16x128xf32, #tpu.memory_space<vmem>>, vector<2x128xf32>
    %132 = arith.truncf %102 : vector<2x32xf32> to vector<2x32xbf16>
    %cst_55 = arith.constant dense<0.000000e+00> : vector<2x128xf32>
    %133 = tpu.matmul %132, %14, %cst_55 {dimension_numbers = #tpu.dot_dimension_numbers<[1], [0], [0], [1], [0, 0, 1, 1], [], []>} : vector<2x32xbf16>, vector<32x128xbf16>, vector<2x128xf32> -> vector<2x128xf32>
    %134 = arith.addf %131, %133 : vector<2x128xf32>
    %135 = arith.negf %134 : vector<2x128xf32>
    %136 = math.exp %135 : vector<2x128xf32>
    %cst_56 = arith.constant 1.000000e+00 : f32
    %137 = vector.broadcast %cst_56 : f32 to vector<2x128xf32>
    %138 = arith.addf %137, %136 : vector<2x128xf32>
    %139 = arith.divf %137, %138 : vector<2x128xf32>
    %cst_57 = arith.constant 2.000000e+00 : f32
    %140 = vector.broadcast %cst_57 : f32 to vector<2x128xf32>
    %141 = arith.mulf %140, %139 : vector<2x128xf32>
    %cst_58 = arith.constant 1.000000e+00 : f32
    %142 = vector.broadcast %cst_58 : f32 to vector<2x128xf32>
    %143 = arith.subf %141, %142 : vector<2x128xf32>
    %144 = arith.select %13, %143, %139 : vector<2x128xi1>, vector<2x128xf32>
    %145 = vector.extract_strided_slice %144 {offsets = [0, 0], sizes = [2, 32], strides = [1, 1]} : vector<2x128xf32> to vector<2x32xf32>
    %146 = vector.extract_strided_slice %144 {offsets = [0, 32], sizes = [2, 32], strides = [1, 1]} : vector<2x128xf32> to vector<2x32xf32>
    %147 = vector.extract_strided_slice %144 {offsets = [0, 64], sizes = [2, 32], strides = [1, 1]} : vector<2x128xf32> to vector<2x32xf32>
    %148 = vector.extract_strided_slice %144 {offsets = [0, 96], sizes = [2, 32], strides = [1, 1]} : vector<2x128xf32> to vector<2x32xf32>
    %149 = arith.mulf %146, %100 : vector<2x32xf32>
    %150 = arith.mulf %145, %147 : vector<2x32xf32>
    %151 = arith.addf %149, %150 : vector<2x32xf32>
    %152 = math.tanh %151 : vector<2x32xf32>
    %153 = arith.mulf %148, %152 : vector<2x32xf32>
    %154 = tpu.concatenate %153, %126 in 1 : vector<2x32xf32>, vector<2x32xf32> -> vector<2x64xf32>
    %155 = arith.truncf %154 : vector<2x64xf32> to vector<2x64xbf16>
    %cst_59 = arith.constant dense<0.000000e+00> : vector<2x128xf32>
    %156 = tpu.matmul %155, %16, %cst_59 {dimension_numbers = #tpu.dot_dimension_numbers<[1], [0], [0], [1], [0, 0, 1, 1], [], []>} : vector<2x64xbf16>, vector<64x128xbf16>, vector<2x128xf32> -> vector<2x128xf32>
    %157 = vector.broadcast %18 : vector<1x128xf32> to vector<2x128xf32>
    %158 = arith.addf %156, %157 : vector<2x128xf32>
    %159 = arith.negf %158 : vector<2x128xf32>
    %160 = math.exp %159 : vector<2x128xf32>
    %cst_60 = arith.constant 1.000000e+00 : f32
    %161 = vector.broadcast %cst_60 : f32 to vector<2x128xf32>
    %162 = arith.addf %161, %160 : vector<2x128xf32>
    %163 = arith.divf %161, %162 : vector<2x128xf32>
    %cst_61 = arith.constant 2.000000e+00 : f32
    %164 = vector.broadcast %cst_61 : f32 to vector<2x128xf32>
    %165 = arith.mulf %164, %163 : vector<2x128xf32>
    %cst_62 = arith.constant 1.000000e+00 : f32
    %166 = vector.broadcast %cst_62 : f32 to vector<2x128xf32>
    %167 = arith.subf %165, %166 : vector<2x128xf32>
    %168 = arith.select %13, %167, %163 : vector<2x128xi1>, vector<2x128xf32>
    %169 = vector.extract_strided_slice %168 {offsets = [0, 0], sizes = [2, 32], strides = [1, 1]} : vector<2x128xf32> to vector<2x32xf32>
    %170 = vector.extract_strided_slice %168 {offsets = [0, 32], sizes = [2, 32], strides = [1, 1]} : vector<2x128xf32> to vector<2x32xf32>
    %171 = vector.extract_strided_slice %168 {offsets = [0, 64], sizes = [2, 32], strides = [1, 1]} : vector<2x128xf32> to vector<2x32xf32>
    %172 = vector.extract_strided_slice %168 {offsets = [0, 96], sizes = [2, 32], strides = [1, 1]} : vector<2x128xf32> to vector<2x32xf32>
    %173 = arith.mulf %170, %124 : vector<2x32xf32>
    %174 = arith.mulf %169, %171 : vector<2x32xf32>
    %175 = arith.addf %173, %174 : vector<2x32xf32>
    %176 = math.tanh %175 : vector<2x32xf32>
    %177 = arith.mulf %172, %176 : vector<2x32xf32>
    %178 = arith.index_cast %129 : i32 to index
    %c0_63 = arith.constant 0 : index
    %179 = vector.load %arg12[%178, %c0_63] : memref<16x32xf32, #tpu.memory_space<vmem>>, vector<2x32xf32>
    tpu.vector_store %arg12[%178, %c0_63], %177 {strides = array<i32>} : memref<16x32xf32, #tpu.memory_space<vmem>>, vector<2x32xf32>,
    %c3_i32 = arith.constant 3 : i32
    %c2_i32_64 = arith.constant 2 : i32
    %180 = arith.muli %c3_i32, %c2_i32_64 : i32
    %181 = arith.index_cast %180 : i32 to index
    %c0_65 = arith.constant 0 : index
    %182 = vector.load %arg11[%181, %c0_65] : memref<16x128xf32, #tpu.memory_space<vmem>>, vector<2x128xf32>
    %183 = arith.truncf %153 : vector<2x32xf32> to vector<2x32xbf16>
    %cst_66 = arith.constant dense<0.000000e+00> : vector<2x128xf32>
    %184 = tpu.matmul %183, %14, %cst_66 {dimension_numbers = #tpu.dot_dimension_numbers<[1], [0], [0], [1], [0, 0, 1, 1], [], []>} : vector<2x32xbf16>, vector<32x128xbf16>, vector<2x128xf32> -> vector<2x128xf32>
    %185 = arith.addf %182, %184 : vector<2x128xf32>
    %186 = arith.negf %185 : vector<2x128xf32>
    %187 = math.exp %186 : vector<2x128xf32>
    %cst_67 = arith.constant 1.000000e+00 : f32
    %188 = vector.broadcast %cst_67 : f32 to vector<2x128xf32>
    %189 = arith.addf %188, %187 : vector<2x128xf32>
    %190 = arith.divf %188, %189 : vector<2x128xf32>
    %cst_68 = arith.constant 2.000000e+00 : f32
    %191 = vector.broadcast %cst_68 : f32 to vector<2x128xf32>
    %192 = arith.mulf %191, %190 : vector<2x128xf32>
    %cst_69 = arith.constant 1.000000e+00 : f32
    %193 = vector.broadcast %cst_69 : f32 to vector<2x128xf32>
    %194 = arith.subf %192, %193 : vector<2x128xf32>
    %195 = arith.select %13, %194, %190 : vector<2x128xi1>, vector<2x128xf32>
    %196 = vector.extract_strided_slice %195 {offsets = [0, 0], sizes = [2, 32], strides = [1, 1]} : vector<2x128xf32> to vector<2x32xf32>
    %197 = vector.extract_strided_slice %195 {offsets = [0, 32], sizes = [2, 32], strides = [1, 1]} : vector<2x128xf32> to vector<2x32xf32>
    %198 = vector.extract_strided_slice %195 {offsets = [0, 64], sizes = [2, 32], strides = [1, 1]} : vector<2x128xf32> to vector<2x32xf32>
    %199 = vector.extract_strided_slice %195 {offsets = [0, 96], sizes = [2, 32], strides = [1, 1]} : vector<2x128xf32> to vector<2x32xf32>
    %200 = arith.mulf %197, %151 : vector<2x32xf32>
    %201 = arith.mulf %196, %198 : vector<2x32xf32>
    %202 = arith.addf %200, %201 : vector<2x32xf32>
    %203 = math.tanh %202 : vector<2x32xf32>
    %204 = arith.mulf %199, %203 : vector<2x32xf32>
    %205 = tpu.concatenate %204, %177 in 1 : vector<2x32xf32>, vector<2x32xf32> -> vector<2x64xf32>
    %206 = arith.truncf %205 : vector<2x64xf32> to vector<2x64xbf16>
    %cst_70 = arith.constant dense<0.000000e+00> : vector<2x128xf32>
    %207 = tpu.matmul %206, %16, %cst_70 {dimension_numbers = #tpu.dot_dimension_numbers<[1], [0], [0], [1], [0, 0, 1, 1], [], []>} : vector<2x64xbf16>, vector<64x128xbf16>, vector<2x128xf32> -> vector<2x128xf32>
    %208 = vector.broadcast %18 : vector<1x128xf32> to vector<2x128xf32>
    %209 = arith.addf %207, %208 : vector<2x128xf32>
    %210 = arith.negf %209 : vector<2x128xf32>
    %211 = math.exp %210 : vector<2x128xf32>
    %cst_71 = arith.constant 1.000000e+00 : f32
    %212 = vector.broadcast %cst_71 : f32 to vector<2x128xf32>
    %213 = arith.addf %212, %211 : vector<2x128xf32>
    %214 = arith.divf %212, %213 : vector<2x128xf32>
    %cst_72 = arith.constant 2.000000e+00 : f32
    %215 = vector.broadcast %cst_72 : f32 to vector<2x128xf32>
    %216 = arith.mulf %215, %214 : vector<2x128xf32>
    %cst_73 = arith.constant 1.000000e+00 : f32
    %217 = vector.broadcast %cst_73 : f32 to vector<2x128xf32>
    %218 = arith.subf %216, %217 : vector<2x128xf32>
    %219 = arith.select %13, %218, %214 : vector<2x128xi1>, vector<2x128xf32>
    %220 = vector.extract_strided_slice %219 {offsets = [0, 0], sizes = [2, 32], strides = [1, 1]} : vector<2x128xf32> to vector<2x32xf32>
    %221 = vector.extract_strided_slice %219 {offsets = [0, 32], sizes = [2, 32], strides = [1, 1]} : vector<2x128xf32> to vector<2x32xf32>
    %222 = vector.extract_strided_slice %219 {offsets = [0, 64], sizes = [2, 32], strides = [1, 1]} : vector<2x128xf32> to vector<2x32xf32>
    %223 = vector.extract_strided_slice %219 {offsets = [0, 96], sizes = [2, 32], strides = [1, 1]} : vector<2x128xf32> to vector<2x32xf32>
    %224 = arith.mulf %221, %175 : vector<2x32xf32>
    %225 = arith.mulf %220, %222 : vector<2x32xf32>
    %226 = arith.addf %224, %225 : vector<2x32xf32>
    %227 = math.tanh %226 : vector<2x32xf32>
    %228 = arith.mulf %223, %227 : vector<2x32xf32>
    %229 = arith.index_cast %180 : i32 to index
    %c0_74 = arith.constant 0 : index
    %230 = vector.load %arg12[%229, %c0_74] : memref<16x32xf32, #tpu.memory_space<vmem>>, vector<2x32xf32>
    tpu.vector_store %arg12[%229, %c0_74], %228 {strides = array<i32>} : memref<16x32xf32, #tpu.memory_space<vmem>>, vector<2x32xf32>,
    %c4_i32 = arith.constant 4 : i32
    %c2_i32_75 = arith.constant 2 : i32
    %231 = arith.muli %c4_i32, %c2_i32_75 : i32
    %232 = arith.index_cast %231 : i32 to index
    %c0_76 = arith.constant 0 : index
    %233 = vector.load %arg11[%232, %c0_76] : memref<16x128xf32, #tpu.memory_space<vmem>>, vector<2x128xf32>
    %234 = arith.truncf %204 : vector<2x32xf32> to vector<2x32xbf16>
    %cst_77 = arith.constant dense<0.000000e+00> : vector<2x128xf32>
    %235 = tpu.matmul %234, %14, %cst_77 {dimension_numbers = #tpu.dot_dimension_numbers<[1], [0], [0], [1], [0, 0, 1, 1], [], []>} : vector<2x32xbf16>, vector<32x128xbf16>, vector<2x128xf32> -> vector<2x128xf32>
    %236 = arith.addf %233, %235 : vector<2x128xf32>
    %237 = arith.negf %236 : vector<2x128xf32>
    %238 = math.exp %237 : vector<2x128xf32>
    %cst_78 = arith.constant 1.000000e+00 : f32
    %239 = vector.broadcast %cst_78 : f32 to vector<2x128xf32>
    %240 = arith.addf %239, %238 : vector<2x128xf32>
    %241 = arith.divf %239, %240 : vector<2x128xf32>
    %cst_79 = arith.constant 2.000000e+00 : f32
    %242 = vector.broadcast %cst_79 : f32 to vector<2x128xf32>
    %243 = arith.mulf %242, %241 : vector<2x128xf32>
    %cst_80 = arith.constant 1.000000e+00 : f32
    %244 = vector.broadcast %cst_80 : f32 to vector<2x128xf32>
    %245 = arith.subf %243, %244 : vector<2x128xf32>
    %246 = arith.select %13, %245, %241 : vector<2x128xi1>, vector<2x128xf32>
    %247 = vector.extract_strided_slice %246 {offsets = [0, 0], sizes = [2, 32], strides = [1, 1]} : vector<2x128xf32> to vector<2x32xf32>
    %248 = vector.extract_strided_slice %246 {offsets = [0, 32], sizes = [2, 32], strides = [1, 1]} : vector<2x128xf32> to vector<2x32xf32>
    %249 = vector.extract_strided_slice %246 {offsets = [0, 64], sizes = [2, 32], strides = [1, 1]} : vector<2x128xf32> to vector<2x32xf32>
    %250 = vector.extract_strided_slice %246 {offsets = [0, 96], sizes = [2, 32], strides = [1, 1]} : vector<2x128xf32> to vector<2x32xf32>
    %251 = arith.mulf %248, %202 : vector<2x32xf32>
    %252 = arith.mulf %247, %249 : vector<2x32xf32>
    %253 = arith.addf %251, %252 : vector<2x32xf32>
    %254 = math.tanh %253 : vector<2x32xf32>
    %255 = arith.mulf %250, %254 : vector<2x32xf32>
    %256 = tpu.concatenate %255, %228 in 1 : vector<2x32xf32>, vector<2x32xf32> -> vector<2x64xf32>
    %257 = arith.truncf %256 : vector<2x64xf32> to vector<2x64xbf16>
    %cst_81 = arith.constant dense<0.000000e+00> : vector<2x128xf32>
    %258 = tpu.matmul %257, %16, %cst_81 {dimension_numbers = #tpu.dot_dimension_numbers<[1], [0], [0], [1], [0, 0, 1, 1], [], []>} : vector<2x64xbf16>, vector<64x128xbf16>, vector<2x128xf32> -> vector<2x128xf32>
    %259 = vector.broadcast %18 : vector<1x128xf32> to vector<2x128xf32>
    %260 = arith.addf %258, %259 : vector<2x128xf32>
    %261 = arith.negf %260 : vector<2x128xf32>
    %262 = math.exp %261 : vector<2x128xf32>
    %cst_82 = arith.constant 1.000000e+00 : f32
    %263 = vector.broadcast %cst_82 : f32 to vector<2x128xf32>
    %264 = arith.addf %263, %262 : vector<2x128xf32>
    %265 = arith.divf %263, %264 : vector<2x128xf32>
    %cst_83 = arith.constant 2.000000e+00 : f32
    %266 = vector.broadcast %cst_83 : f32 to vector<2x128xf32>
    %267 = arith.mulf %266, %265 : vector<2x128xf32>
    %cst_84 = arith.constant 1.000000e+00 : f32
    %268 = vector.broadcast %cst_84 : f32 to vector<2x128xf32>
    %269 = arith.subf %267, %268 : vector<2x128xf32>
    %270 = arith.select %13, %269, %265 : vector<2x128xi1>, vector<2x128xf32>
    %271 = vector.extract_strided_slice %270 {offsets = [0, 0], sizes = [2, 32], strides = [1, 1]} : vector<2x128xf32> to vector<2x32xf32>
    %272 = vector.extract_strided_slice %270 {offsets = [0, 32], sizes = [2, 32], strides = [1, 1]} : vector<2x128xf32> to vector<2x32xf32>
    %273 = vector.extract_strided_slice %270 {offsets = [0, 64], sizes = [2, 32], strides = [1, 1]} : vector<2x128xf32> to vector<2x32xf32>
    %274 = vector.extract_strided_slice %270 {offsets = [0, 96], sizes = [2, 32], strides = [1, 1]} : vector<2x128xf32> to vector<2x32xf32>
    %275 = arith.mulf %272, %226 : vector<2x32xf32>
    %276 = arith.mulf %271, %273 : vector<2x32xf32>
    %277 = arith.addf %275, %276 : vector<2x32xf32>
    %278 = math.tanh %277 : vector<2x32xf32>
    %279 = arith.mulf %274, %278 : vector<2x32xf32>
    %280 = arith.index_cast %231 : i32 to index
    %c0_85 = arith.constant 0 : index
    %281 = vector.load %arg12[%280, %c0_85] : memref<16x32xf32, #tpu.memory_space<vmem>>, vector<2x32xf32>
    tpu.vector_store %arg12[%280, %c0_85], %279 {strides = array<i32>} : memref<16x32xf32, #tpu.memory_space<vmem>>, vector<2x32xf32>,
    %c5_i32 = arith.constant 5 : i32
    %c2_i32_86 = arith.constant 2 : i32
    %282 = arith.muli %c5_i32, %c2_i32_86 : i32
    %283 = arith.index_cast %282 : i32 to index
    %c0_87 = arith.constant 0 : index
    %284 = vector.load %arg11[%283, %c0_87] : memref<16x128xf32, #tpu.memory_space<vmem>>, vector<2x128xf32>
    %285 = arith.truncf %255 : vector<2x32xf32> to vector<2x32xbf16>
    %cst_88 = arith.constant dense<0.000000e+00> : vector<2x128xf32>
    %286 = tpu.matmul %285, %14, %cst_88 {dimension_numbers = #tpu.dot_dimension_numbers<[1], [0], [0], [1], [0, 0, 1, 1], [], []>} : vector<2x32xbf16>, vector<32x128xbf16>, vector<2x128xf32> -> vector<2x128xf32>
    %287 = arith.addf %284, %286 : vector<2x128xf32>
    %288 = arith.negf %287 : vector<2x128xf32>
    %289 = math.exp %288 : vector<2x128xf32>
    %cst_89 = arith.constant 1.000000e+00 : f32
    %290 = vector.broadcast %cst_89 : f32 to vector<2x128xf32>
    %291 = arith.addf %290, %289 : vector<2x128xf32>
    %292 = arith.divf %290, %291 : vector<2x128xf32>
    %cst_90 = arith.constant 2.000000e+00 : f32
    %293 = vector.broadcast %cst_90 : f32 to vector<2x128xf32>
    %294 = arith.mulf %293, %292 : vector<2x128xf32>
    %cst_91 = arith.constant 1.000000e+00 : f32
    %295 = vector.broadcast %cst_91 : f32 to vector<2x128xf32>
    %296 = arith.subf %294, %295 : vector<2x128xf32>
    %297 = arith.select %13, %296, %292 : vector<2x128xi1>, vector<2x128xf32>
    %298 = vector.extract_strided_slice %297 {offsets = [0, 0], sizes = [2, 32], strides = [1, 1]} : vector<2x128xf32> to vector<2x32xf32>
    %299 = vector.extract_strided_slice %297 {offsets = [0, 32], sizes = [2, 32], strides = [1, 1]} : vector<2x128xf32> to vector<2x32xf32>
    %300 = vector.extract_strided_slice %297 {offsets = [0, 64], sizes = [2, 32], strides = [1, 1]} : vector<2x128xf32> to vector<2x32xf32>
    %301 = vector.extract_strided_slice %297 {offsets = [0, 96], sizes = [2, 32], strides = [1, 1]} : vector<2x128xf32> to vector<2x32xf32>
    %302 = arith.mulf %299, %253 : vector<2x32xf32>
    %303 = arith.mulf %298, %300 : vector<2x32xf32>
    %304 = arith.addf %302, %303 : vector<2x32xf32>
    %305 = math.tanh %304 : vector<2x32xf32>
    %306 = arith.mulf %301, %305 : vector<2x32xf32>
    %307 = tpu.concatenate %306, %279 in 1 : vector<2x32xf32>, vector<2x32xf32> -> vector<2x64xf32>
    %308 = arith.truncf %307 : vector<2x64xf32> to vector<2x64xbf16>
    %cst_92 = arith.constant dense<0.000000e+00> : vector<2x128xf32>
    %309 = tpu.matmul %308, %16, %cst_92 {dimension_numbers = #tpu.dot_dimension_numbers<[1], [0], [0], [1], [0, 0, 1, 1], [], []>} : vector<2x64xbf16>, vector<64x128xbf16>, vector<2x128xf32> -> vector<2x128xf32>
    %310 = vector.broadcast %18 : vector<1x128xf32> to vector<2x128xf32>
    %311 = arith.addf %309, %310 : vector<2x128xf32>
    %312 = arith.negf %311 : vector<2x128xf32>
    %313 = math.exp %312 : vector<2x128xf32>
    %cst_93 = arith.constant 1.000000e+00 : f32
    %314 = vector.broadcast %cst_93 : f32 to vector<2x128xf32>
    %315 = arith.addf %314, %313 : vector<2x128xf32>
    %316 = arith.divf %314, %315 : vector<2x128xf32>
    %cst_94 = arith.constant 2.000000e+00 : f32
    %317 = vector.broadcast %cst_94 : f32 to vector<2x128xf32>
    %318 = arith.mulf %317, %316 : vector<2x128xf32>
    %cst_95 = arith.constant 1.000000e+00 : f32
    %319 = vector.broadcast %cst_95 : f32 to vector<2x128xf32>
    %320 = arith.subf %318, %319 : vector<2x128xf32>
    %321 = arith.select %13, %320, %316 : vector<2x128xi1>, vector<2x128xf32>
    %322 = vector.extract_strided_slice %321 {offsets = [0, 0], sizes = [2, 32], strides = [1, 1]} : vector<2x128xf32> to vector<2x32xf32>
    %323 = vector.extract_strided_slice %321 {offsets = [0, 32], sizes = [2, 32], strides = [1, 1]} : vector<2x128xf32> to vector<2x32xf32>
    %324 = vector.extract_strided_slice %321 {offsets = [0, 64], sizes = [2, 32], strides = [1, 1]} : vector<2x128xf32> to vector<2x32xf32>
    %325 = vector.extract_strided_slice %321 {offsets = [0, 96], sizes = [2, 32], strides = [1, 1]} : vector<2x128xf32> to vector<2x32xf32>
    %326 = arith.mulf %323, %277 : vector<2x32xf32>
    %327 = arith.mulf %322, %324 : vector<2x32xf32>
    %328 = arith.addf %326, %327 : vector<2x32xf32>
    %329 = math.tanh %328 : vector<2x32xf32>
    %330 = arith.mulf %325, %329 : vector<2x32xf32>
    %331 = arith.index_cast %282 : i32 to index
    %c0_96 = arith.constant 0 : index
    %332 = vector.load %arg12[%331, %c0_96] : memref<16x32xf32, #tpu.memory_space<vmem>>, vector<2x32xf32>
    tpu.vector_store %arg12[%331, %c0_96], %330 {strides = array<i32>} : memref<16x32xf32, #tpu.memory_space<vmem>>, vector<2x32xf32>,
    %c6_i32 = arith.constant 6 : i32
    %c2_i32_97 = arith.constant 2 : i32
    %333 = arith.muli %c6_i32, %c2_i32_97 : i32
    %334 = arith.index_cast %333 : i32 to index
    %c0_98 = arith.constant 0 : index
    %335 = vector.load %arg11[%334, %c0_98] : memref<16x128xf32, #tpu.memory_space<vmem>>, vector<2x128xf32>
    %336 = arith.truncf %306 : vector<2x32xf32> to vector<2x32xbf16>
    %cst_99 = arith.constant dense<0.000000e+00> : vector<2x128xf32>
    %337 = tpu.matmul %336, %14, %cst_99 {dimension_numbers = #tpu.dot_dimension_numbers<[1], [0], [0], [1], [0, 0, 1, 1], [], []>} : vector<2x32xbf16>, vector<32x128xbf16>, vector<2x128xf32> -> vector<2x128xf32>
    %338 = arith.addf %335, %337 : vector<2x128xf32>
    %339 = arith.negf %338 : vector<2x128xf32>
    %340 = math.exp %339 : vector<2x128xf32>
    %cst_100 = arith.constant 1.000000e+00 : f32
    %341 = vector.broadcast %cst_100 : f32 to vector<2x128xf32>
    %342 = arith.addf %341, %340 : vector<2x128xf32>
    %343 = arith.divf %341, %342 : vector<2x128xf32>
    %cst_101 = arith.constant 2.000000e+00 : f32
    %344 = vector.broadcast %cst_101 : f32 to vector<2x128xf32>
    %345 = arith.mulf %344, %343 : vector<2x128xf32>
    %cst_102 = arith.constant 1.000000e+00 : f32
    %346 = vector.broadcast %cst_102 : f32 to vector<2x128xf32>
    %347 = arith.subf %345, %346 : vector<2x128xf32>
    %348 = arith.select %13, %347, %343 : vector<2x128xi1>, vector<2x128xf32>
    %349 = vector.extract_strided_slice %348 {offsets = [0, 0], sizes = [2, 32], strides = [1, 1]} : vector<2x128xf32> to vector<2x32xf32>
    %350 = vector.extract_strided_slice %348 {offsets = [0, 32], sizes = [2, 32], strides = [1, 1]} : vector<2x128xf32> to vector<2x32xf32>
    %351 = vector.extract_strided_slice %348 {offsets = [0, 64], sizes = [2, 32], strides = [1, 1]} : vector<2x128xf32> to vector<2x32xf32>
    %352 = vector.extract_strided_slice %348 {offsets = [0, 96], sizes = [2, 32], strides = [1, 1]} : vector<2x128xf32> to vector<2x32xf32>
    %353 = arith.mulf %350, %304 : vector<2x32xf32>
    %354 = arith.mulf %349, %351 : vector<2x32xf32>
    %355 = arith.addf %353, %354 : vector<2x32xf32>
    %356 = math.tanh %355 : vector<2x32xf32>
    %357 = arith.mulf %352, %356 : vector<2x32xf32>
    %358 = tpu.concatenate %357, %330 in 1 : vector<2x32xf32>, vector<2x32xf32> -> vector<2x64xf32>
    %359 = arith.truncf %358 : vector<2x64xf32> to vector<2x64xbf16>
    %cst_103 = arith.constant dense<0.000000e+00> : vector<2x128xf32>
    %360 = tpu.matmul %359, %16, %cst_103 {dimension_numbers = #tpu.dot_dimension_numbers<[1], [0], [0], [1], [0, 0, 1, 1], [], []>} : vector<2x64xbf16>, vector<64x128xbf16>, vector<2x128xf32> -> vector<2x128xf32>
    %361 = vector.broadcast %18 : vector<1x128xf32> to vector<2x128xf32>
    %362 = arith.addf %360, %361 : vector<2x128xf32>
    %363 = arith.negf %362 : vector<2x128xf32>
    %364 = math.exp %363 : vector<2x128xf32>
    %cst_104 = arith.constant 1.000000e+00 : f32
    %365 = vector.broadcast %cst_104 : f32 to vector<2x128xf32>
    %366 = arith.addf %365, %364 : vector<2x128xf32>
    %367 = arith.divf %365, %366 : vector<2x128xf32>
    %cst_105 = arith.constant 2.000000e+00 : f32
    %368 = vector.broadcast %cst_105 : f32 to vector<2x128xf32>
    %369 = arith.mulf %368, %367 : vector<2x128xf32>
    %cst_106 = arith.constant 1.000000e+00 : f32
    %370 = vector.broadcast %cst_106 : f32 to vector<2x128xf32>
    %371 = arith.subf %369, %370 : vector<2x128xf32>
    %372 = arith.select %13, %371, %367 : vector<2x128xi1>, vector<2x128xf32>
    %373 = vector.extract_strided_slice %372 {offsets = [0, 0], sizes = [2, 32], strides = [1, 1]} : vector<2x128xf32> to vector<2x32xf32>
    %374 = vector.extract_strided_slice %372 {offsets = [0, 32], sizes = [2, 32], strides = [1, 1]} : vector<2x128xf32> to vector<2x32xf32>
    %375 = vector.extract_strided_slice %372 {offsets = [0, 64], sizes = [2, 32], strides = [1, 1]} : vector<2x128xf32> to vector<2x32xf32>
    %376 = vector.extract_strided_slice %372 {offsets = [0, 96], sizes = [2, 32], strides = [1, 1]} : vector<2x128xf32> to vector<2x32xf32>
    %377 = arith.mulf %374, %328 : vector<2x32xf32>
    %378 = arith.mulf %373, %375 : vector<2x32xf32>
    %379 = arith.addf %377, %378 : vector<2x32xf32>
    %380 = math.tanh %379 : vector<2x32xf32>
    %381 = arith.mulf %376, %380 : vector<2x32xf32>
    %382 = arith.index_cast %333 : i32 to index
    %c0_107 = arith.constant 0 : index
    %383 = vector.load %arg12[%382, %c0_107] : memref<16x32xf32, #tpu.memory_space<vmem>>, vector<2x32xf32>
    tpu.vector_store %arg12[%382, %c0_107], %381 {strides = array<i32>} : memref<16x32xf32, #tpu.memory_space<vmem>>, vector<2x32xf32>,
    %c7_i32 = arith.constant 7 : i32
    %c2_i32_108 = arith.constant 2 : i32
    %384 = arith.muli %c7_i32, %c2_i32_108 : i32
    %385 = arith.index_cast %384 : i32 to index
    %c0_109 = arith.constant 0 : index
    %386 = vector.load %arg11[%385, %c0_109] : memref<16x128xf32, #tpu.memory_space<vmem>>, vector<2x128xf32>
    %387 = arith.truncf %357 : vector<2x32xf32> to vector<2x32xbf16>
    %cst_110 = arith.constant dense<0.000000e+00> : vector<2x128xf32>
    %388 = tpu.matmul %387, %14, %cst_110 {dimension_numbers = #tpu.dot_dimension_numbers<[1], [0], [0], [1], [0, 0, 1, 1], [], []>} : vector<2x32xbf16>, vector<32x128xbf16>, vector<2x128xf32> -> vector<2x128xf32>
    %389 = arith.addf %386, %388 : vector<2x128xf32>
    %390 = arith.negf %389 : vector<2x128xf32>
    %391 = math.exp %390 : vector<2x128xf32>
    %cst_111 = arith.constant 1.000000e+00 : f32
    %392 = vector.broadcast %cst_111 : f32 to vector<2x128xf32>
    %393 = arith.addf %392, %391 : vector<2x128xf32>
    %394 = arith.divf %392, %393 : vector<2x128xf32>
    %cst_112 = arith.constant 2.000000e+00 : f32
    %395 = vector.broadcast %cst_112 : f32 to vector<2x128xf32>
    %396 = arith.mulf %395, %394 : vector<2x128xf32>
    %cst_113 = arith.constant 1.000000e+00 : f32
    %397 = vector.broadcast %cst_113 : f32 to vector<2x128xf32>
    %398 = arith.subf %396, %397 : vector<2x128xf32>
    %399 = arith.select %13, %398, %394 : vector<2x128xi1>, vector<2x128xf32>
    %400 = vector.extract_strided_slice %399 {offsets = [0, 0], sizes = [2, 32], strides = [1, 1]} : vector<2x128xf32> to vector<2x32xf32>
    %401 = vector.extract_strided_slice %399 {offsets = [0, 32], sizes = [2, 32], strides = [1, 1]} : vector<2x128xf32> to vector<2x32xf32>
    %402 = vector.extract_strided_slice %399 {offsets = [0, 64], sizes = [2, 32], strides = [1, 1]} : vector<2x128xf32> to vector<2x32xf32>
    %403 = vector.extract_strided_slice %399 {offsets = [0, 96], sizes = [2, 32], strides = [1, 1]} : vector<2x128xf32> to vector<2x32xf32>
    %404 = arith.mulf %401, %355 : vector<2x32xf32>
    %405 = arith.mulf %400, %402 : vector<2x32xf32>
    %406 = arith.addf %404, %405 : vector<2x32xf32>
    %407 = math.tanh %406 : vector<2x32xf32>
    %408 = arith.mulf %403, %407 : vector<2x32xf32>
    %409 = tpu.concatenate %408, %381 in 1 : vector<2x32xf32>, vector<2x32xf32> -> vector<2x64xf32>
    %410 = arith.truncf %409 : vector<2x64xf32> to vector<2x64xbf16>
    %cst_114 = arith.constant dense<0.000000e+00> : vector<2x128xf32>
    %411 = tpu.matmul %410, %16, %cst_114 {dimension_numbers = #tpu.dot_dimension_numbers<[1], [0], [0], [1], [0, 0, 1, 1], [], []>} : vector<2x64xbf16>, vector<64x128xbf16>, vector<2x128xf32> -> vector<2x128xf32>
    %412 = vector.broadcast %18 : vector<1x128xf32> to vector<2x128xf32>
    %413 = arith.addf %411, %412 : vector<2x128xf32>
    %414 = arith.negf %413 : vector<2x128xf32>
    %415 = math.exp %414 : vector<2x128xf32>
    %cst_115 = arith.constant 1.000000e+00 : f32
    %416 = vector.broadcast %cst_115 : f32 to vector<2x128xf32>
    %417 = arith.addf %416, %415 : vector<2x128xf32>
    %418 = arith.divf %416, %417 : vector<2x128xf32>
    %cst_116 = arith.constant 2.000000e+00 : f32
    %419 = vector.broadcast %cst_116 : f32 to vector<2x128xf32>
    %420 = arith.mulf %419, %418 : vector<2x128xf32>
    %cst_117 = arith.constant 1.000000e+00 : f32
    %421 = vector.broadcast %cst_117 : f32 to vector<2x128xf32>
    %422 = arith.subf %420, %421 : vector<2x128xf32>
    %423 = arith.select %13, %422, %418 : vector<2x128xi1>, vector<2x128xf32>
    %424 = vector.extract_strided_slice %423 {offsets = [0, 0], sizes = [2, 32], strides = [1, 1]} : vector<2x128xf32> to vector<2x32xf32>
    %425 = vector.extract_strided_slice %423 {offsets = [0, 32], sizes = [2, 32], strides = [1, 1]} : vector<2x128xf32> to vector<2x32xf32>
    %426 = vector.extract_strided_slice %423 {offsets = [0, 64], sizes = [2, 32], strides = [1, 1]} : vector<2x128xf32> to vector<2x32xf32>
    %427 = vector.extract_strided_slice %423 {offsets = [0, 96], sizes = [2, 32], strides = [1, 1]} : vector<2x128xf32> to vector<2x32xf32>
    %428 = arith.mulf %425, %379 : vector<2x32xf32>
    %429 = arith.mulf %424, %426 : vector<2x32xf32>
    %430 = arith.addf %428, %429 : vector<2x32xf32>
    %431 = math.tanh %430 : vector<2x32xf32>
    %432 = arith.mulf %427, %431 : vector<2x32xf32>
    %433 = arith.index_cast %384 : i32 to index
    %c0_118 = arith.constant 0 : index
    %434 = vector.load %arg12[%433, %c0_118] : memref<16x32xf32, #tpu.memory_space<vmem>>, vector<2x32xf32>
    tpu.vector_store %arg12[%433, %c0_118], %432 {strides = array<i32>} : memref<16x32xf32, #tpu.memory_space<vmem>>, vector<2x32xf32>,
    %c8_i32 = arith.constant 8 : i32
    %c0_119 = arith.constant 0 : index
    %c0_120 = arith.constant 0 : index
    %c0_121 = arith.constant 0 : index
    %c0_122 = arith.constant 0 : index
    %435 = vector.load %arg10[%c0_119, %c0_120, %c0_121, %c0_122] : memref<2x2x2x32xf32, #tpu.memory_space<vmem>>, vector<1x1x2x32xf32>
    %436 = vector.shape_cast %435 : vector<1x1x2x32xf32> to vector<2x32xf32>
    %437 = vector.shape_cast %408 : vector<2x32xf32> to vector<1x1x2x32xf32>
    tpu.vector_store %arg10[%c0_119, %c0_120, %c0_121, %c0_122], %437 {strides = array<i32>} : memref<2x2x2x32xf32, #tpu.memory_space<vmem>>, vector<1x1x2x32xf32>,
    %c1_123 = arith.constant 1 : index
    %c0_124 = arith.constant 0 : index
    %c0_125 = arith.constant 0 : index
    %c0_126 = arith.constant 0 : index
    %438 = vector.load %arg10[%c1_123, %c0_124, %c0_125, %c0_126] : memref<2x2x2x32xf32, #tpu.memory_space<vmem>>, vector<1x1x2x32xf32>
    %439 = vector.shape_cast %438 : vector<1x1x2x32xf32> to vector<2x32xf32>
    %440 = vector.shape_cast %406 : vector<2x32xf32> to vector<1x1x2x32xf32>
    tpu.vector_store %arg10[%c1_123, %c0_124, %c0_125, %c0_126], %440 {strides = array<i32>} : memref<2x2x2x32xf32, #tpu.memory_space<vmem>>, vector<1x1x2x32xf32>,
    %c0_127 = arith.constant 0 : index
    %c1_128 = arith.constant 1 : index
    %c0_129 = arith.constant 0 : index
    %c0_130 = arith.constant 0 : index
    %441 = vector.load %arg10[%c0_127, %c1_128, %c0_129, %c0_130] : memref<2x2x2x32xf32, #tpu.memory_space<vmem>>, vector<1x1x2x32xf32>
    %442 = vector.shape_cast %441 : vector<1x1x2x32xf32> to vector<2x32xf32>
    %443 = vector.shape_cast %432 : vector<2x32xf32> to vector<1x1x2x32xf32>
    tpu.vector_store %arg10[%c0_127, %c1_128, %c0_129, %c0_130], %443 {strides = array<i32>} : memref<2x2x2x32xf32, #tpu.memory_space<vmem>>, vector<1x1x2x32xf32>,
    %c1_131 = arith.constant 1 : index
    %c1_132 = arith.constant 1 : index
    %c0_133 = arith.constant 0 : index
    %c0_134 = arith.constant 0 : index
    %444 = vector.load %arg10[%c1_131, %c1_132, %c0_133, %c0_134] : memref<2x2x2x32xf32, #tpu.memory_space<vmem>>, vector<1x1x2x32xf32>
    %445 = vector.shape_cast %444 : vector<1x1x2x32xf32> to vector<2x32xf32>
    %446 = vector.shape_cast %430 : vector<2x32xf32> to vector<1x1x2x32xf32>
    tpu.vector_store %arg10[%c1_131, %c1_132, %c0_133, %c0_134], %446 {strides = array<i32>} : memref<2x2x2x32xf32, #tpu.memory_space<vmem>>, vector<1x1x2x32xf32>,
    %c0_135 = arith.constant 0 : index
    %c0_136 = arith.constant 0 : index
    %447 = vector.load %arg12[%c0_135, %c0_136] : memref<16x32xf32, #tpu.memory_space<vmem>>, vector<16x32xf32>
    %448 = arith.truncf %447 : vector<16x32xf32> to vector<16x32xbf16>
    %c0_137 = arith.constant 0 : index
    %c0_138 = arith.constant 0 : index
    %449 = vector.load %arg7[%c0_137, %c0_138] : memref<32x16xbf16, #tpu.memory_space<vmem>>, vector<32x16xbf16>
    %cst_139 = arith.constant dense<0.000000e+00> : vector<16x16xf32>
    %450 = tpu.matmul %448, %449, %cst_139 {dimension_numbers = #tpu.dot_dimension_numbers<[1], [0], [0], [1], [0, 0, 1, 1], [], []>} : vector<16x32xbf16>, vector<32x16xbf16>, vector<16x16xf32> -> vector<16x16xf32>
    %c0_140 = arith.constant 0 : index
    %c0_141 = arith.constant 0 : index
    %451 = vector.load %arg8[%c0_140, %c0_141] : memref<1x16xf32, #tpu.memory_space<vmem>>, vector<1x16xf32>
    %452 = vector.broadcast %451 : vector<1x16xf32> to vector<16x16xf32>
    %453 = arith.addf %450, %452 : vector<16x16xf32>
    %c0_142 = arith.constant 0 : index
    %c0_143 = arith.constant 0 : index
    %454 = vector.load %arg9[%c0_142, %c0_143] : memref<16x16xf32, #tpu.memory_space<vmem>>, vector<16x16xf32>
    tpu.vector_store %arg9[%c0_142, %c0_143], %453 {strides = array<i32>} : memref<16x16xf32, #tpu.memory_space<vmem>>, vector<16x16xf32>,
    return
  }
  func.func @transform_0(%arg0: i32) -> (i32, i32) {
    %c0_i32 = arith.constant 0 : i32
    %c0_i32_0 = arith.constant 0 : i32
    %c0_i32_1 = arith.constant 0 : i32
    return %c0_i32, %c0_i32_0 : i32, i32
  }
  func.func @transform_1(%arg0: i32) -> (i32, i32, i32, i32) {
    %c0_i32 = arith.constant 0 : i32
    %c0_i32_0 = arith.constant 0 : i32
    %c0_i32_1 = arith.constant 0 : i32
    %c0_i32_2 = arith.constant 0 : i32
    %c0_i32_3 = arith.constant 0 : i32
    return %c0_i32, %c0_i32_0, %c0_i32_1, %c0_i32_2 : i32, i32, i32, i32
  }
  func.func @transform_2(%arg0: i32) -> (i32, i32) {
    %c0_i32 = arith.constant 0 : i32
    %c0_i32_0 = arith.constant 0 : i32
    %c0_i32_1 = arith.constant 0 : i32
    return %c0_i32, %c0_i32_0 : i32, i32
  }
  func.func @transform_3(%arg0: i32) -> (i32, i32) {
    %c0_i32 = arith.constant 0 : i32
    %c0_i32_0 = arith.constant 0 : i32
    %c0_i32_1 = arith.constant 0 : i32
    return %c0_i32, %c0_i32_0 : i32, i32
  }
  func.func @transform_4(%arg0: i32) -> (i32, i32, i32) {
    %c0_i32 = arith.constant 0 : i32
    %c0_i32_0 = arith.constant 0 : i32
    %c0_i32_1 = arith.constant 0 : i32
    %c0_i32_2 = arith.constant 0 : i32
    return %c0_i32, %c0_i32_0, %c0_i32_1 : i32, i32, i32
  }
  func.func @transform_5(%arg0: i32) -> (i32, i32, i32) {
    %c0_i32 = arith.constant 0 : i32
    %c0_i32_0 = arith.constant 0 : i32
    %c0_i32_1 = arith.constant 0 : i32
    %c0_i32_2 = arith.constant 0 : i32
    return %c0_i32, %c0_i32_0, %c0_i32_1 : i32, i32, i32
  }
  func.func @transform_6(%arg0: i32) -> (i32, i32) {
    %c0_i32 = arith.constant 0 : i32
    %c0_i32_0 = arith.constant 0 : i32
    %c0_i32_1 = arith.constant 0 : i32
    return %c0_i32, %c0_i32_0 : i32, i32
  }
  func.func @transform_7(%arg0: i32) -> (i32, i32) {
    %c0_i32 = arith.constant 0 : i32
    %c0_i32_0 = arith.constant 0 : i32
    %c0_i32_1 = arith.constant 0 : i32
    return %c0_i32, %c0_i32_0 : i32, i32
  }
  func.func @transform_8(%arg0: i32) -> (i32, i32) {
    %c0_i32 = arith.constant 0 : i32
    %c0_i32_0 = arith.constant 0 : i32
    %c0_i32_1 = arith.constant 0 : i32
    return %c0_i32, %c0_i32_0 : i32, i32
  }
  func.func @transform_9(%arg0: i32) -> (i32, i32, i32, i32) {
    %c0_i32 = arith.constant 0 : i32
    %c0_i32_0 = arith.constant 0 : i32
    %c0_i32_1 = arith.constant 0 : i32
    %c0_i32_2 = arith.constant 0 : i32
    %c0_i32_3 = arith.constant 0 : i32
    return %c0_i32, %c0_i32_0, %c0_i32_1, %c0_i32_2 : i32, i32, i32, i32
  }
}

</mosaic_0001>

<bundles_post_ra>
// kernel: lstm_forward.1
= control target key start
LH: loop header
LB: loop body
LE: loop exit
PB: predicated region body
PF: predicated region fallthrough
CT: control target
= control target key end

     0   :  { %vm51_vm0 = vcmask 130048   ;;  %vm111_vm1 = vcmask 261120   ;;  %v71_v20 = vlaneseq  ;;  %s1465_s18 = smov 64   ;;  %s1466_s21 = smov 32   ;;  %vm209_vm9 = vcmask 523264   ;;  %s1898_s2 = inlined_call_operand.vmem [shape: bf16[16,128], index: 2, kind: input, shape index: {}]   ;;  %s1899_s3 = inlined_call_operand.vmem [shape: bf16[32,128], index: 3, kind: input, shape index: {}]   ;;  %s1900_s0 = inlined_call_operand.vmem [shape: bf16[16,16], index: 0, kind: input, shape index: {}]   ;;  %s1901_s1 = inlined_call_operand.vmem [shape: f32[2,2,2,32], index: 1, kind: input, shape index: {}]   ;;  %s1902_s5 = inlined_call_operand.vmem [shape: f32[2,1,128], index: 5, kind: input, shape index: {}]   ;;  %s1903_s4 = inlined_call_operand.vmem [shape: bf16[1,64,128], index: 4, kind: input, shape index: {}]   ;;  %s1904_s9 = inlined_call_operand.vmem [shape: f32[2,2,2,32], index: 9, kind: output, shape index: {1}]   ;;  %s1905_s6 = inlined_call_operand.vmem [shape: bf16[32,16], index: 6, kind: input, shape index: {}]   ;;  %s1906_s7 = inlined_call_operand.vmem [shape: f32[1,16], index: 7, kind: input, shape index: {}]   ;;  %s1907_s8 = inlined_call_operand.vmem [shape: f32[16,16], index: 8, kind: output, shape index: {0}]  }
   0x1   :  { %v1348_v0 = vld [vmem:[%s1898_s2] sm:$0xff]  ;;  %v1524_v1 = vld [vmem:[%s1899_s3 + $0x8] sm:$0xff]  ;;  %v1569_v42 = vld [vmem:[%s1903_s4 + $0x18] sm:$0xff]  ;;  %s1467_s16 = smov 96  }
   0x2   :  { %v1347_v2 = vld [vmem:[%s1900_s0] sm:$0xff]  ;;  %62 = vmatpush.bf16.msra.mxu0 %v1348_v0  ;;  %121 = vmatpush.bf16.msra.mxu1 %v1524_v1  ;;  %v72_v23 = vand.u32 127, %v71_v20  ;;  %v1575_v43 = vld [vmem:[%s1903_s4 + $0x10] sm:$0xff]  ;;  %v1583_v44 = vld [vmem:[%s1903_s4 + $0x8] sm:$0xff] }
   0x3   :  { %v1533_v3 = vld [vmem:[%s1899_s3] sm:$0xff]  ;;  %289 = vmatpush.bf16.msra.mxu3 %v1524_v1  ;;  %217 = vmatpush.bf16.msra.mxu2 %v1569_v42 }
   0x4   :  { %v90_v4 = vld [vmem:[%s1901_s1] sm:$0x3]  ;;  %vm73_vm5 = vcmp.ge.s32.totalorder %v72_v23, 64  ;;  %vm74_vm6 = vcmp.lt.s32.totalorder %v72_v23, 96  ;;  %v1261_v34 = vld [vmem:[%s1901_s1 + $0x4] sm:$0x3] }
   0x5   :  { %1258 = vmatmul.msk.bf16.vlgmr.msra.gmra.mxu0 %vm51_vm0, %v1347_v2  ;;  %v98_v5 = vpack.c.bf16 %v90_v4, %v90_v4  ;;  %v1365_v6 = vld [vmem:[%s1902_s5] ss:$0 sm:$0xff]  ;;  %vm1550_vm8 = vmand %vm73_vm5, %vm74_vm6  ;;  %v1260_v46 = vld [vmem:[%s1901_s1 + $0x2] sm:$0x3] }
   0x6   :  { %122 = vmatpush.bf16.msra.mxu1 %v1533_v3  ;;  %352 = vmatpush.bf16.msrb.mxu0 %v1569_v42  ;;  %v1598_v50 = vld [vmem:[%s1903_s4] sm:$0xff] }
   0x7   :  { %290 = vmatpush.bf16.msra.mxu3 %v1533_v3  ;;  %218 = vmatpush.bf16.msra.mxu2 %v1575_v43  ;;  %v1262_v51 = vld [vmem:[%s1901_s1 + $0x6] sm:$0x3]  ;;  %v1625_v58 = vld [vmem:[%s1902_s5 + $0x1] ss:$0 sm:$0xff] }
   0x9   :  { %1271 = vmatmul.msk.bf16.vlgmr.msra.gmra.mxu1 %vm111_vm1, %v98_v5 }
   0xa   :  { %419 = vmatpush.bf16.msrb.mxu1 %v1524_v1  ;;  %353 = vmatpush.bf16.msrb.mxu0 %v1575_v43 }
   0xb   :  { %482 = vmatpush.bf16.msrb.mxu3 %v1569_v42  ;;  %219 = vmatpush.bf16.msra.mxu2 %v1583_v44 }
   0xe   :  { %420 = vmatpush.bf16.msrb.mxu1 %v1533_v3  ;;  %354 = vmatpush.bf16.msrb.mxu0 %v1583_v44 }
   0xf   :  { %483 = vmatpush.bf16.msrb.mxu3 %v1575_v43  ;;  %220 = vmatpush.bf16.msra.mxu2 %v1598_v50 }
  0x12   :  { %679 = vmatpush.bf16.msra.mxu1 %v1524_v1  ;;  %355 = vmatpush.bf16.msrb.mxu0 %v1598_v50 }
  0x13   :  { %484 = vmatpush.bf16.msrb.mxu3 %v1583_v44  ;;  %549 = vmatpush.bf16.msrb.mxu2 %v1524_v1 }
  0x16   :  { %680 = vmatpush.bf16.msra.mxu1 %v1533_v3  ;;  %612 = vmatpush.bf16.msra.mxu0 %v1569_v42 }
  0x17   :  { %485 = vmatpush.bf16.msrb.mxu3 %v1598_v50  ;;  %550 = vmatpush.bf16.msrb.mxu2 %v1533_v3 }
  0x1a   :  { %613 = vmatpush.bf16.msra.mxu0 %v1575_v43 }
  0x1e   :  { %614 = vmatpush.bf16.msra.mxu0 %v1583_v44 }
  0x22   :  { %615 = vmatpush.bf16.msra.mxu0 %v1598_v50 }
  0x82   :  { %v64_v7 = vpop.f32.mrf.mxu0 }
  0x83   :  { %v65_v8 = vadd.f32 %v1365_v6, %v64_v7 }
  0x85   :  { %69 = vst [vmem:[#allocation2] sm:$0xff] %v65_v8 }
  0x86   :  { %v124_v9 = vpop.f32.mrf.mxu1 }
  0x8a   :  { %v66_v10 = vpop.f32.mrf.mxu0 }
  0x8b   :  { %v67_v11 = vadd.f32 %v1365_v6, %v66_v10 }
  0x8c   :  { %v97_v12 = vld [vmem:[#allocation2] sm:$0x3]  ;;  %v275_v62 = vld [vmem:[#allocation2 + $0x2] sm:$0x3] }
  0x8d   :  { %v128_v13 = vadd.f32 %v124_v9, %v97_v12  ;;  %70 = vst [vmem:[#allocation2 + $0x8] sm:$0xff] %v67_v11 }
  0x8e   :  { %v126_v14 = vpop.f32.mrf.mxu1 }
  0x8f   :  { %v1272_v15 = vmul.f32 -1.442695, %v128_v13 }
  0x91   :  { %1368 = vpow2.f32 %v1272_v15 }
  0x97   :  { %v1369_v16 = vpop.eup %1368 }
  0x98   :  { %v132_v17 = vadd.f32 1.0, %v1369_v16 }
  0x9a   :  { %1370 = vrcp.f32 %v132_v17  ;;  %v144_v22 = vand.u32 2147483648, %v132_v17  ;;  %v142_v25 = vand.u32 2147483647, %v132_v17  ;;  %vm138_vm3 = vweird.f32 %v132_v17 }
  0x9c   :  { %v145_v27 = vor.u32 1.1754944e-38, %v144_v22  ;;  %vm143_vm7 = vcmp.eq.f32.partialorder %v142_v25, 8.507059e+37 }
  0xa0   :  { %v1371_v18 = vpop.eup %1370 }
  0xa1   :  { %v134_v19 = vmul.f32 %v1371_v18, %v132_v17  ;;  %vm139_vm2 = vweird.f32 %v1371_v18 }
  0xa2   :  { %vm140_vm4 = vmor %vm138_vm3, %vm139_vm2 }
  0xa3   :  { %v135_v21 = vsub.f32 1.0, %v134_v19 }
  0xa5   :  { %v136_v24 = vmul.f32 %v1371_v18, %v135_v21 }
  0xa7   :  { %v137_v26 = vadd.f32 %v1371_v18, %v136_v24 }
  0xa9   :  { %v141_v28 = vsel %vm140_vm4, %v1371_v18, %v137_v26 }
  0xaa   :  { %v146_v29 = vsel %vm143_vm7, %v145_v27, %v141_v28 }
  0xab   :  { %v148_v30 = vmul.f32 2.0, %v146_v29 }
  0xad   :  { %v1273_v32 = vadd.f32 -1.0, %v148_v30 }
  0xaf   :  { %v150_v33 = vsel %vm1550_vm8, %v1273_v32, %v146_v29 }
  0xb0   :  { %157 = vrot.lane.b32.xlu0 %v150_v33, %s1465_s18 }
  0xb8   :  { %152 = vrot.lane.b32.xlu0 %v1261_v34, %s1466_s21 }
 0x122   :  { %v158_v35 = vpop.permute.xlu0 %157 }
 0x123   :  { %v160_v36 = vmul.f32 %v158_v35, %v150_v33 }
 0x125   :  { %162 = vrot.lane.b32.xlu1 %v160_v36, %s1466_s21 }
 0x12a   :  { %v153_v37 = vpop.permute.xlu0 %152 }
 0x12b   :  { %v155_v38 = vmul.f32 %v153_v37, %v150_v33 }
 0x197   :  { %v163_v39 = vpop.permute.xlu1 %162 }
 0x198   :  { %v1562_v40 = vadd.f32 %v163_v39, %v155_v38 }
 0x19a   :  { %1372 = vtanh.f32 %v1562_v40 }
 0x1a0   :  { %v1373_v41 = vpop.eup %1372 }
 0x1a1   :  { %168 = vrot.lane.b32.xlu1 %v1373_v41, %s1465_s18 }
 0x213   :  { %v169_v45 = vpop.permute.xlu1 %168 }
 0x214   :  { %v171_v47 = vmul.f32 %v169_v45, %v150_v33 }
 0x216   :  { %v1360_v48 = vpack.i.bf16 %v1260_v46, %v171_v47  ;;  %v276_v49 = vpack.c.bf16 %v171_v47, %v171_v47 }
 0x218   :  { %1361 = vrot.lane.b32.xlu2 %v1360_v48, %s1466_s21 }
 0x220   :  { %278 = vrot.lane.b32.xlu2 %v276_v49, %s1466_s21 }
 0x228   :  { %249 = vrot.lane.b32.xlu2 %v1262_v51, %s1466_s21 }
 0x272   :  { %v1362_v52 = vpop.permute.xlu2 %1361 }
 0x273   :  { %v1364_v53 = vunpack.i.h.bf16 %v1362_v52  ;;  %v1363_v54 = vunpack.i.l.bf16 %v1362_v52 }
 0x275   :  { %v180_v55 = vsel %vm111_vm1, %v1363_v54, %v1364_v53 }
 0x276   :  { %v181_v56 = vpack.c.bf16 %v180_v55, %v180_v55 }
 0x278   :  { %1290 = vmatmul.msk.bf16.vlgmr.msra.gmra.mxu2 %vm209_vm9, %v181_v56 }
 0x279   :  { %809 = vmatpush.bf16.msra.mxu2 %v1524_v1 }
 0x27a   :  { %v279_v57 = vpop.permute.xlu2 %278 }
 0x27b   :  { %1293 = vmatmul.msk.bf16.vlgmr.msra.gmra.mxu3 %vm111_vm1, %v279_v57 }
 0x27c   :  { %742 = vmatpush.bf16.msra.mxu3 %v1569_v42 }
 0x27d   :  { %810 = vmatpush.bf16.msra.mxu2 %v1533_v3 }
 0x280   :  { %743 = vmatpush.bf16.msra.mxu3 %v1575_v43 }
 0x282   :  { %v250_v45 = vpop.permute.xlu2 %249 }
 0x284   :  { %744 = vmatpush.bf16.msra.mxu3 %v1583_v44 }
 0x288   :  { %745 = vmatpush.bf16.msra.mxu3 %v1598_v50 }
 0x2fb   :  { %v222_v59 = vpop.f32.mrf.mxu2 }
 0x2fc   :  { %v223_v60 = vadd.f32 %v1625_v58, %v222_v59 }
 0x2fe   :  { %v1291_v61 = vmul.f32 -1.442695, %v223_v60  ;;  %v292_v63 = vpop.f32.mrf.mxu3 }
 0x2ff   :  { %v296_v0 = vadd.f32 %v292_v63, %v275_v62 }
 0x300   :  { %1374 = vpow2.f32 %v1291_v61 }
 0x301   :  { %v1294_v2 = vmul.f32 -1.442695, %v296_v0 }
 0x303   :  { %1376 = vpow2.f32 %v1294_v2  ;;  %v224_v4 = vpop.f32.mrf.mxu2  ;;  %v405_v2 = vld [vmem:[#allocation2 + $0x4] sm:$0x3] }
 0x306   :  { %v1375_v5 = vpop.eup %1374  ;;  %v294_v6 = vpop.f32.mrf.mxu3 }
 0x307   :  { %v229_v7 = vadd.f32 1.0, %v1375_v5 }
 0x309   :  { %v1377_v8 = vpop.eup %1376  ;;  %1378 = vrcp.f32 %v229_v7  ;;  %v241_v15 = vand.u32 2147483648, %v229_v7  ;;  %v239_v17 = vand.u32 2147483647, %v229_v7  ;;  %vm235_vm11 = vweird.f32 %v229_v7 }
 0x30a   :  { %v300_v9 = vadd.f32 1.0, %v1377_v8 }
 0x30b   :  { %v242_v21 = vor.u32 1.1754944e-38, %v241_v15  ;;  %vm240_vm14 = vcmp.eq.f32.partialorder %v239_v17, 8.507059e+37 }
 0x30c   :  { %1380 = vrcp.f32 %v300_v9  ;;  %v312_v20 = vand.u32 2147483648, %v300_v9  ;;  %v310_v23 = vand.u32 2147483647, %v300_v9  ;;  %vm306_vm15 = vweird.f32 %v300_v9 }
 0x30e   :  { %v313_v28 = vor.u32 1.1754944e-38, %v312_v20  ;;  %vm311_vm3 = vcmp.eq.f32.partialorder %v310_v23, 8.507059e+37 }
 0x30f   :  { %v1379_v10 = vpop.eup %1378 }
 0x310   :  { %v231_v11 = vmul.f32 %v1379_v10, %v229_v7  ;;  %vm236_vm10 = vweird.f32 %v1379_v10 }
 0x311   :  { %vm237_vm12 = vmor %vm235_vm11, %vm236_vm10 }
 0x312   :  { %v1381_v12 = vpop.eup %1380  ;;  %v232_v13 = vsub.f32 1.0, %v231_v11 }
 0x313   :  { %v302_v14 = vmul.f32 %v1381_v12, %v300_v9  ;;  %vm307_vm13 = vweird.f32 %v1381_v12 }
 0x314   :  { %v233_v16 = vmul.f32 %v1379_v10, %v232_v13  ;;  %vm308_vm2 = vmor %vm306_vm15, %vm307_vm13 }
 0x315   :  { %v303_v18 = vsub.f32 1.0, %v302_v14 }
 0x316   :  { %v234_v19 = vadd.f32 %v1379_v10, %v233_v16 }
 0x317   :  { %v304_v22 = vmul.f32 %v1381_v12, %v303_v18 }
 0x318   :  { %v238_v24 = vsel %vm237_vm12, %v1379_v10, %v234_v19 }
 0x319   :  { %v243_v25 = vsel %vm240_vm14, %v242_v21, %v238_v24  ;;  %v305_v26 = vadd.f32 %v1381_v12, %v304_v22 }
 0x31a   :  { %v245_v27 = vmul.f32 2.0, %v243_v25 }
 0x31b   :  { %v309_v29 = vsel %vm308_vm2, %v1381_v12, %v305_v26 }
 0x31c   :  { %v1292_v30 = vadd.f32 -1.0, %v245_v27  ;;  %v314_v32 = vsel %vm311_vm3, %v313_v28, %v309_v29 }
 0x31d   :  { %v316_v33 = vmul.f32 2.0, %v314_v32 }
 0x31e   :  { %v247_v34 = vsel %vm1550_vm8, %v1292_v30, %v243_v25 }
 0x31f   :  { %254 = vrot.lane.b32.xlu0 %v247_v34, %s1465_s18  ;;  %v1295_v35 = vadd.f32 -1.0, %v316_v33  ;;  %v252_v46 = vmul.f32 %v250_v45, %v247_v34 }
 0x321   :  { %v318_v36 = vsel %vm1550_vm8, %v1295_v35, %v314_v32 }
 0x322   :  { %321 = vrot.lane.b32.xlu1 %v318_v36, %s1465_s18  ;;  %v319_v49 = vmul.f32 %v318_v36, %v1562_v40 }
 0x391   :  { %v255_v37 = vpop.permute.xlu0 %254 }
 0x392   :  { %v257_v38 = vmul.f32 %v255_v37, %v247_v34 }
 0x394   :  { %259 = vrot.lane.b32.xlu0 %v257_v38, %s1466_s21  ;;  %v322_v39 = vpop.permute.xlu1 %321 }
 0x395   :  { %v324_v41 = vmul.f32 %v322_v39, %v318_v36 }
 0x397   :  { %326 = vrot.lane.b32.xlu1 %v324_v41, %s1466_s21 }
 0x406   :  { %v260_v47 = vpop.permute.xlu0 %259 }
 0x407   :  { %v1636_v48 = vadd.f32 %v260_v47, %v252_v46 }
 0x409   :  { %1382 = vtanh.f32 %v1636_v48  ;;  %v327_v51 = vpop.permute.xlu1 %326 }
 0x40a   :  { %v1640_v52 = vadd.f32 %v327_v51, %v319_v49 }
 0x40c   :  { %1384 = vtanh.f32 %v1640_v52 }
 0x40f   :  { %v1383_v53 = vpop.eup %1382 }
 0x410   :  { %265 = vrot.lane.b32.xlu2 %v1383_v53, %s1465_s18 }
 0x412   :  { %v1385_v54 = vpop.eup %1384 }
 0x413   :  { %332 = vrot.lane.b32.xlu0 %v1385_v54, %s1465_s18 }
 0x46a   :  { %v266_v55 = vpop.permute.xlu2 %265 }
 0x46b   :  { %v1645_v56 = vmul.f32 %v266_v55, %v247_v34 }
 0x46d   :  { %340 = vrot.lane.b32.xlu2 %v1645_v56, %s1465_s18 }
 0x485   :  { %v333_v40 = vpop.permute.xlu0 %332 }
 0x486   :  { %v335_v57 = vmul.f32 %v333_v40, %v318_v36 }
 0x488   :  { %v406_v59 = vpack.c.bf16 %v335_v57, %v335_v57  ;;  %337 = vrot.lane.b32.xlu1 %v335_v57, %s1466_s21 }
 0x48a   :  { %408 = vrot.lane.b32.xlu0 %v406_v59, %s1466_s21 }
 0x4c7   :  { %v341_v60 = vpop.permute.xlu2 %340 }
 0x4fa   :  { %v338_v61 = vpop.permute.xlu1 %337 }
 0x4fb   :  { %v343_v62 = vsel %vm111_vm1, %v338_v61, %v341_v60 }
 0x4fc   :  { %v344_v63 = vpack.c.bf16 %v343_v62, %v343_v62  ;;  %v409_v0 = vpop.permute.xlu0 %408 }
 0x4fd   :  { %1299 = vmatmul.msk.bf16.vlgmr.msrb.gmra.mxu1 %vm111_vm1, %v409_v0 }
 0x4fe   :  { %1296 = vmatmul.msk.bf16.vlgmr.msrb.gmra.mxu0 %vm209_vm9, %v344_v63  ;;  %939 = vmatpush.bf16.msrb.mxu1 %v1524_v1 }
 0x4ff   :  { %872 = vmatpush.bf16.msrb.mxu0 %v1569_v42 }
 0x502   :  { %940 = vmatpush.bf16.msrb.mxu1 %v1533_v3 }
 0x503   :  { %873 = vmatpush.bf16.msrb.mxu0 %v1575_v43 }
 0x507   :  { %874 = vmatpush.bf16.msrb.mxu0 %v1583_v44 }
 0x50b   :  { %875 = vmatpush.bf16.msrb.mxu0 %v1598_v50 }
 0x57a   :  { %v422_v4 = vpop.f32.mrf.mxu1 }
 0x57b   :  { %v426_v5 = vadd.f32 %v422_v4, %v405_v2  ;;  %v357_v6 = vpop.f32.mrf.mxu0 }
 0x57c   :  { %v358_v7 = vadd.f32 %v1625_v58, %v357_v6 }
 0x57d   :  { %v1300_v8 = vmul.f32 -1.442695, %v426_v5 }
 0x57e   :  { %v1297_v9 = vmul.f32 -1.442695, %v358_v7 }
 0x57f   :  { %1386 = vpow2.f32 %v1300_v8 }
 0x580   :  { %1388 = vpow2.f32 %v1297_v9  ;;  %v535_v9 = vld [vmem:[#allocation2 + $0x6] sm:$0x3] }
 0x582   :  { %v424_v10 = vpop.f32.mrf.mxu1 }
 0x583   :  { %v359_v11 = vpop.f32.mrf.mxu0 }
 0x585   :  { %v1387_v12 = vpop.eup %1386 }
 0x586   :  { %v1389_v13 = vpop.eup %1388  ;;  %v430_v14 = vadd.f32 1.0, %v1387_v12 }
 0x587   :  { %v364_v15 = vadd.f32 1.0, %v1389_v13 }
 0x588   :  { %1390 = vrcp.f32 %v430_v14  ;;  %v442_v22 = vand.u32 2147483648, %v430_v14  ;;  %v440_v24 = vand.u32 2147483647, %v430_v14  ;;  %vm436_vm6 = vweird.f32 %v430_v14 }
 0x589   :  { %1392 = vrcp.f32 %v364_v15  ;;  %v376_v25 = vand.u32 2147483648, %v364_v15  ;;  %v374_v27 = vand.u32 2147483647, %v364_v15  ;;  %vm370_vm10 = vweird.f32 %v364_v15 }
 0x58a   :  { %v443_v29 = vor.u32 1.1754944e-38, %v442_v22  ;;  %vm441_vm11 = vcmp.eq.f32.partialorder %v440_v24, 8.507059e+37 }
 0x58b   :  { %v377_v33 = vor.u32 1.1754944e-38, %v376_v25  ;;  %vm375_vm13 = vcmp.eq.f32.partialorder %v374_v27, 8.507059e+37 }
 0x58e   :  { %v1391_v16 = vpop.eup %1390 }
 0x58f   :  { %v1393_v17 = vpop.eup %1392  ;;  %v432_v18 = vmul.f32 %v1391_v16, %v430_v14  ;;  %vm437_vm4 = vweird.f32 %v1391_v16 }
 0x590   :  { %v366_v19 = vmul.f32 %v1393_v17, %v364_v15  ;;  %vm371_vm5 = vweird.f32 %v1393_v17  ;;  %vm438_vm7 = vmor %vm436_vm6, %vm437_vm4 }
 0x591   :  { %v433_v20 = vsub.f32 1.0, %v432_v18  ;;  %vm372_vm12 = vmor %vm370_vm10, %vm371_vm5 }
 0x592   :  { %v367_v21 = vsub.f32 1.0, %v366_v19 }
 0x593   :  { %v434_v23 = vmul.f32 %v1391_v16, %v433_v20 }
 0x594   :  { %v368_v26 = vmul.f32 %v1393_v17, %v367_v21 }
 0x595   :  { %v435_v28 = vadd.f32 %v1391_v16, %v434_v23 }
 0x596   :  { %v369_v30 = vadd.f32 %v1393_v17, %v368_v26 }
 0x597   :  { %v439_v32 = vsel %vm438_vm7, %v1391_v16, %v435_v28 }
 0x598   :  { %v444_v34 = vsel %vm441_vm11, %v443_v29, %v439_v32  ;;  %v373_v35 = vsel %vm372_vm12, %v1393_v17, %v369_v30 }
 0x599   :  { %v446_v36 = vmul.f32 2.0, %v444_v34  ;;  %v378_v37 = vsel %vm375_vm13, %v377_v33, %v373_v35 }
 0x59a   :  { %v380_v38 = vmul.f32 2.0, %v378_v37 }
 0x59b   :  { %v1301_v39 = vadd.f32 -1.0, %v446_v36 }
 0x59c   :  { %v1298_v41 = vadd.f32 -1.0, %v380_v38 }
 0x59d   :  { %v448_v45 = vsel %vm1550_vm8, %v1301_v39, %v444_v34 }
 0x59e   :  { %451 = vrot.lane.b32.xlu2 %v448_v45, %s1465_s18  ;;  %v382_v46 = vsel %vm1550_vm8, %v1298_v41, %v378_v37  ;;  %v449_v54 = vmul.f32 %v448_v45, %v1640_v52 }
 0x59f   :  { %385 = vrot.lane.b32.xlu1 %v382_v46, %s1465_s18  ;;  %v383_v59 = vmul.f32 %v382_v46, %v1636_v48 }
 0x5f8   :  { %v452_v47 = vpop.permute.xlu2 %451 }
 0x5f9   :  { %v454_v49 = vmul.f32 %v452_v47, %v448_v45 }
 0x5fb   :  { %456 = vrot.lane.b32.xlu1 %v454_v49, %s1466_s21 }
 0x611   :  { %v386_v51 = vpop.permute.xlu1 %385 }
 0x612   :  { %v388_v53 = vmul.f32 %v386_v51, %v382_v46 }
 0x614   :  { %390 = vrot.lane.b32.xlu0 %v388_v53, %s1466_s21 }
 0x66d   :  { %v457_v55 = vpop.permute.xlu1 %456 }
 0x66e   :  { %v1670_v40 = vadd.f32 %v457_v55, %v449_v54 }
 0x670   :  { %1394 = vtanh.f32 %v1670_v40 }
 0x676   :  { %v1395_v57 = vpop.eup %1394 }
 0x677   :  { %462 = vrot.lane.b32.xlu0 %v1395_v57, %s1465_s18 }
 0x686   :  { %v391_v60 = vpop.permute.xlu0 %390 }
 0x687   :  { %v1675_v61 = vadd.f32 %v391_v60, %v383_v59 }
 0x689   :  { %1396 = vtanh.f32 %v1675_v61 }
 0x68f   :  { %v1397_v62 = vpop.eup %1396 }
 0x690   :  { %396 = vrot.lane.b32.xlu2 %v1397_v62, %s1465_s18 }
 0x6e9   :  { %v463_v63 = vpop.permute.xlu0 %462 }
 0x6ea   :  { %v465_v52 = vmul.f32 %v463_v63, %v448_v45  ;;  %v397_v0 = vpop.permute.xlu2 %396 }
 0x6eb   :  { %v1679_v2 = vmul.f32 %v397_v0, %v382_v46 }
 0x6ec   :  { %v536_v4 = vpack.c.bf16 %v465_v52, %v465_v52  ;;  %467 = vrot.lane.b32.xlu1 %v465_v52, %s1466_s21 }
 0x6ed   :  { %470 = vrot.lane.b32.xlu2 %v1679_v2, %s1465_s18 }
 0x6ee   :  { %538 = vrot.lane.b32.xlu0 %v536_v4, %s1466_s21 }
 0x747   :  { %v471_v48 = vpop.permute.xlu2 %470 }
 0x75e   :  { %v468_v5 = vpop.permute.xlu1 %467 }
 0x75f   :  { %v473_v6 = vsel %vm111_vm1, %v468_v5, %v471_v48 }
 0x760   :  { %v474_v7 = vpack.c.bf16 %v473_v6, %v473_v6  ;;  %v539_v8 = vpop.permute.xlu0 %538 }
 0x761   :  { %1305 = vmatmul.msk.bf16.vlgmr.msrb.gmra.mxu2 %vm111_vm1, %v539_v8 }
 0x762   :  { %1302 = vmatmul.msk.bf16.vlgmr.msrb.gmra.mxu3 %vm209_vm9, %v474_v7  ;;  %1069 = vmatpush.bf16.msrb.mxu2 %v1524_v1 }
 0x763   :  { %1002 = vmatpush.bf16.msrb.mxu3 %v1569_v42 }
 0x766   :  { %1070 = vmatpush.bf16.msrb.mxu2 %v1533_v3 }
 0x767   :  { %1003 = vmatpush.bf16.msrb.mxu3 %v1575_v43 }
 0x76b   :  { %1004 = vmatpush.bf16.msrb.mxu3 %v1583_v44 }
 0x76f   :  { %1005 = vmatpush.bf16.msrb.mxu3 %v1598_v50 }
 0x7e4   :  { %v552_v10 = vpop.f32.mrf.mxu2 }
 0x7e5   :  { %v556_v11 = vadd.f32 %v552_v10, %v535_v9  ;;  %v487_v12 = vpop.f32.mrf.mxu3 }
 0x7e6   :  { %v488_v13 = vadd.f32 %v1625_v58, %v487_v12 }
 0x7e7   :  { %v1306_v14 = vmul.f32 -1.442695, %v556_v11 }
 0x7e8   :  { %v1303_v15 = vmul.f32 -1.442695, %v488_v13 }
 0x7e9   :  { %1398 = vpow2.f32 %v1306_v14  ;;  %v665_v14 = vld [vmem:[#allocation2 + $0x8] sm:$0x3] }
 0x7ea   :  { %1400 = vpow2.f32 %v1303_v15 }
 0x7ec   :  { %v554_v1 = vpop.f32.mrf.mxu2 }
 0x7ed   :  { %v489_v16 = vpop.f32.mrf.mxu3 }
 0x7ef   :  { %v1399_v17 = vpop.eup %1398 }
 0x7f0   :  { %v1401_v3 = vpop.eup %1400  ;;  %v560_v18 = vadd.f32 1.0, %v1399_v17 }
 0x7f1   :  { %v494_v19 = vadd.f32 1.0, %v1401_v3 }
 0x7f2   :  { %1402 = vrcp.f32 %v560_v18  ;;  %v572_v26 = vand.u32 2147483648, %v560_v18  ;;  %v570_v28 = vand.u32 2147483647, %v560_v18  ;;  %vm566_vm2 = vweird.f32 %v560_v18 }
 0x7f3   :  { %1404 = vrcp.f32 %v494_v19  ;;  %v506_v29 = vand.u32 2147483648, %v494_v19  ;;  %v504_v32 = vand.u32 2147483647, %v494_v19  ;;  %vm500_vm4 = vweird.f32 %v494_v19 }
 0x7f4   :  { %v573_v34 = vor.u32 1.1754944e-38, %v572_v26  ;;  %vm571_vm5 = vcmp.eq.f32.partialorder %v570_v28, 8.507059e+37 }
 0x7f5   :  { %v507_v37 = vor.u32 1.1754944e-38, %v506_v29  ;;  %vm505_vm7 = vcmp.eq.f32.partialorder %v504_v32, 8.507059e+37 }
 0x7f8   :  { %v1403_v20 = vpop.eup %1402 }
 0x7f9   :  { %v1405_v21 = vpop.eup %1404  ;;  %v562_v22 = vmul.f32 %v1403_v20, %v560_v18  ;;  %vm567_vm14 = vweird.f32 %v1403_v20 }
 0x7fa   :  { %v496_v23 = vmul.f32 %v1405_v21, %v494_v19  ;;  %vm501_vm15 = vweird.f32 %v1405_v21  ;;  %vm568_vm3 = vmor %vm566_vm2, %vm567_vm14 }
 0x7fb   :  { %v563_v24 = vsub.f32 1.0, %v562_v22  ;;  %vm502_vm6 = vmor %vm500_vm4, %vm501_vm15 }
 0x7fc   :  { %v497_v25 = vsub.f32 1.0, %v496_v23 }
 0x7fd   :  { %v564_v27 = vmul.f32 %v1403_v20, %v563_v24 }
 0x7fe   :  { %v498_v30 = vmul.f32 %v1405_v21, %v497_v25 }
 0x7ff   :  { %v565_v33 = vadd.f32 %v1403_v20, %v564_v27 }
 0x800   :  { %v499_v35 = vadd.f32 %v1405_v21, %v498_v30 }
 0x801   :  { %v569_v36 = vsel %vm568_vm3, %v1403_v20, %v565_v33 }
 0x802   :  { %v574_v38 = vsel %vm571_vm5, %v573_v34, %v569_v36  ;;  %v503_v39 = vsel %vm502_vm6, %v1405_v21, %v499_v35 }
 0x803   :  { %v576_v41 = vmul.f32 2.0, %v574_v38  ;;  %v508_v45 = vsel %vm505_vm7, %v507_v37, %v503_v39 }
 0x804   :  { %v510_v46 = vmul.f32 2.0, %v508_v45 }
 0x805   :  { %v1307_v47 = vadd.f32 -1.0, %v576_v41 }
 0x806   :  { %v1304_v49 = vadd.f32 -1.0, %v510_v46 }
 0x807   :  { %v578_v51 = vsel %vm1550_vm8, %v1307_v47, %v574_v38 }
 0x808   :  { %581 = vrot.lane.b32.xlu2 %v578_v51, %s1465_s18  ;;  %v512_v53 = vsel %vm1550_vm8, %v1304_v49, %v508_v45  ;;  %v579_v60 = vmul.f32 %v578_v51, %v1670_v40 }
 0x809   :  { %515 = vrot.lane.b32.xlu1 %v512_v53, %s1465_s18  ;;  %v513_v0 = vmul.f32 %v512_v53, %v1675_v61 }
 0x862   :  { %v582_v54 = vpop.permute.xlu2 %581 }
 0x863   :  { %v584_v55 = vmul.f32 %v582_v54, %v578_v51 }
 0x865   :  { %586 = vrot.lane.b32.xlu1 %v584_v55, %s1466_s21 }
 0x87b   :  { %v516_v57 = vpop.permute.xlu1 %515 }
 0x87c   :  { %v518_v59 = vmul.f32 %v516_v57, %v512_v53 }
 0x87e   :  { %520 = vrot.lane.b32.xlu0 %v518_v59, %s1466_s21 }
 0x8d7   :  { %v587_v62 = vpop.permute.xlu1 %586 }
 0x8d8   :  { %v1704_v63 = vadd.f32 %v587_v62, %v579_v60 }
 0x8da   :  { %1406 = vtanh.f32 %v1704_v63 }
 0x8e0   :  { %v1407_v52 = vpop.eup %1406 }
 0x8e1   :  { %592 = vrot.lane.b32.xlu0 %v1407_v52, %s1465_s18 }
 0x8f0   :  { %v521_v4 = vpop.permute.xlu0 %520 }
 0x8f1   :  { %v1709_v48 = vadd.f32 %v521_v4, %v513_v0 }
 0x8f3   :  { %1408 = vtanh.f32 %v1709_v48 }
 0x8f9   :  { %v1409_v5 = vpop.eup %1408 }
 0x8fa   :  { %526 = vrot.lane.b32.xlu2 %v1409_v5, %s1465_s18 }
 0x953   :  { %v593_v6 = vpop.permute.xlu0 %592 }
 0x954   :  { %v595_v40 = vmul.f32 %v593_v6, %v578_v51  ;;  %v527_v7 = vpop.permute.xlu2 %526 }
 0x955   :  { %v1713_v8 = vmul.f32 %v527_v7, %v512_v53 }
 0x956   :  { %v666_v9 = vpack.c.bf16 %v595_v40, %v595_v40  ;;  %597 = vrot.lane.b32.xlu1 %v595_v40, %s1466_s21 }
 0x957   :  { %600 = vrot.lane.b32.xlu2 %v1713_v8, %s1465_s18 }
 0x958   :  { %668 = vrot.lane.b32.xlu0 %v666_v9, %s1466_s21 }
 0x9b1   :  { %v601_v61 = vpop.permute.xlu2 %600 }
 0x9c8   :  { %v598_v10 = vpop.permute.xlu1 %597 }
 0x9c9   :  { %v603_v11 = vsel %vm111_vm1, %v598_v10, %v601_v61 }
 0x9ca   :  { %v604_v12 = vpack.c.bf16 %v603_v11, %v603_v11  ;;  %v669_v13 = vpop.permute.xlu0 %668 }
 0x9cb   :  { %1311 = vmatmul.msk.bf16.vlgmr.msra.gmra.mxu1 %vm111_vm1, %v669_v13 }
 0x9cc   :  { %1308 = vmatmul.msk.bf16.vlgmr.msra.gmra.mxu0 %vm209_vm9, %v604_v12 }
 0x9cd   :  { %1132 = vmatpush.bf16.msra.mxu0 %v1569_v42 }
 0x9d1   :  { %1133 = vmatpush.bf16.msra.mxu0 %v1575_v43 }
 0x9d5   :  { %1134 = vmatpush.bf16.msra.mxu0 %v1583_v44 }
 0x9d9   :  { %1135 = vmatpush.bf16.msra.mxu0 %v1598_v50 }
 0xa48   :  { %v682_v15 = vpop.f32.mrf.mxu1 }
 0xa49   :  { %v686_v1 = vadd.f32 %v682_v15, %v665_v14  ;;  %v617_v16 = vpop.f32.mrf.mxu0 }
 0xa4a   :  { %v618_v17 = vadd.f32 %v1625_v58, %v617_v16 }
 0xa4b   :  { %v1312_v3 = vmul.f32 -1.442695, %v686_v1  ;;  %v795_v1 = vld [vmem:[#allocation2 + $0xa] sm:$0x3] }
 0xa4c   :  { %v1309_v18 = vmul.f32 -1.442695, %v618_v17 }
 0xa4d   :  { %1410 = vpow2.f32 %v1312_v3 }
 0xa4e   :  { %1412 = vpow2.f32 %v1309_v18 }
 0xa50   :  { %v684_v19 = vpop.f32.mrf.mxu1 }
 0xa51   :  { %v619_v20 = vpop.f32.mrf.mxu0 }
 0xa53   :  { %v1411_v21 = vpop.eup %1410 }
 0xa54   :  { %v1413_v42 = vpop.eup %1412  ;;  %v690_v22 = vadd.f32 1.0, %v1411_v21 }
 0xa55   :  { %v624_v43 = vadd.f32 1.0, %v1413_v42 }
 0xa56   :  { %1414 = vrcp.f32 %v690_v22  ;;  %v702_v27 = vand.u32 2147483648, %v690_v22  ;;  %v700_v29 = vand.u32 2147483647, %v690_v22  ;;  %vm696_vm12 = vweird.f32 %v690_v22 }
 0xa57   :  { %1416 = vrcp.f32 %v624_v43  ;;  %v636_v30 = vand.u32 2147483648, %v624_v43  ;;  %v634_v33 = vand.u32 2147483647, %v624_v43  ;;  %vm630_vm14 = vweird.f32 %v624_v43 }
 0xa58   :  { %v703_v35 = vor.u32 1.1754944e-38, %v702_v27  ;;  %vm701_vm15 = vcmp.eq.f32.partialorder %v700_v29, 8.507059e+37 }
 0xa59   :  { %v637_v38 = vor.u32 1.1754944e-38, %v636_v30  ;;  %vm635_vm3 = vcmp.eq.f32.partialorder %v634_v33, 8.507059e+37 }
 0xa5c   :  { %v1415_v44 = vpop.eup %1414 }
 0xa5d   :  { %v1417_v50 = vpop.eup %1416  ;;  %v692_v23 = vmul.f32 %v1415_v44, %v690_v22  ;;  %vm697_vm10 = vweird.f32 %v1415_v44 }
 0xa5e   :  { %v626_v24 = vmul.f32 %v1417_v50, %v624_v43  ;;  %vm631_vm11 = vweird.f32 %v1417_v50  ;;  %vm698_vm13 = vmor %vm696_vm12, %vm697_vm10 }
 0xa5f   :  { %v693_v25 = vsub.f32 1.0, %v692_v23  ;;  %vm632_vm2 = vmor %vm630_vm14, %vm631_vm11 }
 0xa60   :  { %v627_v26 = vsub.f32 1.0, %v626_v24 }
 0xa61   :  { %v694_v28 = vmul.f32 %v1415_v44, %v693_v25 }
 0xa62   :  { %v628_v32 = vmul.f32 %v1417_v50, %v627_v26 }
 0xa63   :  { %v695_v34 = vadd.f32 %v1415_v44, %v694_v28 }
 0xa64   :  { %v629_v36 = vadd.f32 %v1417_v50, %v628_v32 }
 0xa65   :  { %v699_v37 = vsel %vm698_vm13, %v1415_v44, %v695_v34 }
 0xa66   :  { %v704_v39 = vsel %vm701_vm15, %v703_v35, %v699_v37  ;;  %v633_v41 = vsel %vm632_vm2, %v1417_v50, %v629_v36 }
 0xa67   :  { %v706_v45 = vmul.f32 2.0, %v704_v39  ;;  %v638_v46 = vsel %vm635_vm3, %v637_v38, %v633_v41 }
 0xa68   :  { %v640_v47 = vmul.f32 2.0, %v638_v46 }
 0xa69   :  { %v1313_v49 = vadd.f32 -1.0, %v706_v45 }
 0xa6a   :  { %v1310_v51 = vadd.f32 -1.0, %v640_v47 }
 0xa6b   :  { %v708_v53 = vsel %vm1550_vm8, %v1313_v49, %v704_v39 }
 0xa6c   :  { %711 = vrot.lane.b32.xlu2 %v708_v53, %s1465_s18  ;;  %v642_v54 = vsel %vm1550_vm8, %v1310_v51, %v638_v46  ;;  %v709_v62 = vmul.f32 %v708_v53, %v1704_v63 }
 0xa6d   :  { %645 = vrot.lane.b32.xlu1 %v642_v54, %s1465_s18  ;;  %v643_v5 = vmul.f32 %v642_v54, %v1709_v48 }
 0xac6   :  { %v712_v55 = vpop.permute.xlu2 %711 }
 0xac7   :  { %v714_v57 = vmul.f32 %v712_v55, %v708_v53 }
 0xac9   :  { %716 = vrot.lane.b32.xlu1 %v714_v57, %s1466_s21 }
 0xadf   :  { %v646_v59 = vpop.permute.xlu1 %645 }
 0xae0   :  { %v648_v60 = vmul.f32 %v646_v59, %v642_v54 }
 0xae2   :  { %650 = vrot.lane.b32.xlu0 %v648_v60, %s1466_s21 }
 0xb3b   :  { %v717_v52 = vpop.permute.xlu1 %716 }
 0xb3c   :  { %v1736_v0 = vadd.f32 %v717_v52, %v709_v62 }
 0xb3e   :  { %1418 = vtanh.f32 %v1736_v0 }
 0xb44   :  { %v1419_v4 = vpop.eup %1418 }
 0xb45   :  { %722 = vrot.lane.b32.xlu0 %v1419_v4, %s1465_s18 }
 0xb54   :  { %v651_v6 = vpop.permute.xlu0 %650 }
 0xb55   :  { %v1741_v40 = vadd.f32 %v651_v6, %v643_v5 }
 0xb57   :  { %1420 = vtanh.f32 %v1741_v40 }
 0xb5d   :  { %v1421_v7 = vpop.eup %1420 }
 0xb5e   :  { %656 = vrot.lane.b32.xlu2 %v1421_v7, %s1465_s18 }
 0xbb7   :  { %v723_v9 = vpop.permute.xlu0 %722 }
 0xbb8   :  { %v725_v63 = vmul.f32 %v723_v9, %v708_v53  ;;  %v657_v61 = vpop.permute.xlu2 %656 }
 0xbb9   :  { %v1745_v10 = vmul.f32 %v657_v61, %v642_v54 }
 0xbba   :  { %v796_v11 = vpack.c.bf16 %v725_v63, %v725_v63  ;;  %727 = vrot.lane.b32.xlu1 %v725_v63, %s1466_s21 }
 0xbbb   :  { %730 = vrot.lane.b32.xlu2 %v1745_v10, %s1465_s18 }
 0xbbc   :  { %798 = vrot.lane.b32.xlu0 %v796_v11, %s1466_s21 }
 0xc15   :  { %v731_v48 = vpop.permute.xlu2 %730 }
 0xc2c   :  { %v728_v12 = vpop.permute.xlu1 %727 }
 0xc2d   :  { %v733_v13 = vsel %vm111_vm1, %v728_v12, %v731_v48 }
 0xc2e   :  { %v734_v14 = vpack.c.bf16 %v733_v13, %v733_v13  ;;  %v799_v15 = vpop.permute.xlu0 %798 }
 0xc2f   :  { %1317 = vmatmul.msk.bf16.vlgmr.msra.gmra.mxu2 %vm111_vm1, %v799_v15 }
 0xc30   :  { %1314 = vmatmul.msk.bf16.vlgmr.msra.gmra.mxu3 %vm209_vm9, %v734_v14 }
 0xcb2   :  { %v812_v16 = vpop.f32.mrf.mxu2 }
 0xcb3   :  { %v816_v17 = vadd.f32 %v812_v16, %v795_v1  ;;  %v747_v3 = vpop.f32.mrf.mxu3 }
 0xcb4   :  { %v748_v18 = vadd.f32 %v1625_v58, %v747_v3  ;;  %v925_v3 = vld [vmem:[#allocation2 + $0xc] sm:$0x3] }
 0xcb5   :  { %v1318_v19 = vmul.f32 -1.442695, %v816_v17 }
 0xcb6   :  { %v1315_v20 = vmul.f32 -1.442695, %v748_v18 }
 0xcb7   :  { %1422 = vpow2.f32 %v1318_v19 }
 0xcb8   :  { %1424 = vpow2.f32 %v1315_v20 }
 0xcba   :  { %v814_v21 = vpop.f32.mrf.mxu2 }
 0xcbb   :  { %v749_v42 = vpop.f32.mrf.mxu3 }
 0xcbd   :  { %v1423_v22 = vpop.eup %1422 }
 0xcbe   :  { %v1425_v43 = vpop.eup %1424  ;;  %v820_v44 = vadd.f32 1.0, %v1423_v22 }
 0xcbf   :  { %v754_v50 = vadd.f32 1.0, %v1425_v43 }
 0xcc0   :  { %1426 = vrcp.f32 %v820_v44  ;;  %v832_v29 = vand.u32 2147483648, %v820_v44  ;;  %v830_v32 = vand.u32 2147483647, %v820_v44  ;;  %vm826_vm6 = vweird.f32 %v820_v44 }
 0xcc1   :  { %1428 = vrcp.f32 %v754_v50  ;;  %v766_v33 = vand.u32 2147483648, %v754_v50  ;;  %v764_v35 = vand.u32 2147483647, %v754_v50  ;;  %vm760_vm10 = vweird.f32 %v754_v50 }
 0xcc2   :  { %v833_v37 = vor.u32 1.1754944e-38, %v832_v29  ;;  %vm831_vm11 = vcmp.eq.f32.partialorder %v830_v32, 8.507059e+37 }
 0xcc3   :  { %v767_v41 = vor.u32 1.1754944e-38, %v766_v33  ;;  %vm765_vm13 = vcmp.eq.f32.partialorder %v764_v35, 8.507059e+37 }
 0xcc6   :  { %v1427_v23 = vpop.eup %1426 }
 0xcc7   :  { %v1429_v24 = vpop.eup %1428  ;;  %v822_v25 = vmul.f32 %v1427_v23, %v820_v44  ;;  %vm827_vm4 = vweird.f32 %v1427_v23 }
 0xcc8   :  { %v756_v26 = vmul.f32 %v1429_v24, %v754_v50  ;;  %vm761_vm5 = vweird.f32 %v1429_v24  ;;  %vm828_vm7 = vmor %vm826_vm6, %vm827_vm4 }
 0xcc9   :  { %v823_v27 = vsub.f32 1.0, %v822_v25  ;;  %vm762_vm12 = vmor %vm760_vm10, %vm761_vm5 }
 0xcca   :  { %v757_v28 = vsub.f32 1.0, %v756_v26 }
 0xccb   :  { %v824_v30 = vmul.f32 %v1427_v23, %v823_v27 }
 0xccc   :  { %v758_v34 = vmul.f32 %v1429_v24, %v757_v28 }
 0xccd   :  { %v825_v36 = vadd.f32 %v1427_v23, %v824_v30 }
 0xcce   :  { %v759_v38 = vadd.f32 %v1429_v24, %v758_v34 }
 0xccf   :  { %v829_v39 = vsel %vm828_vm7, %v1427_v23, %v825_v36 }
 0xcd0   :  { %v834_v45 = vsel %vm831_vm11, %v833_v37, %v829_v39  ;;  %v763_v46 = vsel %vm762_vm12, %v1429_v24, %v759_v38 }
 0xcd1   :  { %v836_v47 = vmul.f32 2.0, %v834_v45  ;;  %v768_v49 = vsel %vm765_vm13, %v767_v41, %v763_v46 }
 0xcd2   :  { %v770_v51 = vmul.f32 2.0, %v768_v49 }
 0xcd3   :  { %v1319_v53 = vadd.f32 -1.0, %v836_v47 }
 0xcd4   :  { %v1316_v54 = vadd.f32 -1.0, %v770_v51 }
 0xcd5   :  { %v838_v55 = vsel %vm1550_vm8, %v1319_v53, %v834_v45 }
 0xcd6   :  { %841 = vrot.lane.b32.xlu2 %v838_v55, %s1465_s18  ;;  %v772_v57 = vsel %vm1550_vm8, %v1316_v54, %v768_v49  ;;  %v839_v4 = vmul.f32 %v838_v55, %v1736_v0 }
 0xcd7   :  { %775 = vrot.lane.b32.xlu1 %v772_v57, %s1465_s18  ;;  %v773_v9 = vmul.f32 %v772_v57, %v1741_v40 }
 0xd30   :  { %v842_v59 = vpop.permute.xlu2 %841 }
 0xd31   :  { %v844_v60 = vmul.f32 %v842_v59, %v838_v55 }
 0xd33   :  { %846 = vrot.lane.b32.xlu1 %v844_v60, %s1466_s21 }
 0xd49   :  { %v776_v62 = vpop.permute.xlu1 %775 }
 0xd4a   :  { %v778_v52 = vmul.f32 %v776_v62, %v772_v57 }
 0xd4c   :  { %780 = vrot.lane.b32.xlu0 %v778_v52, %s1466_s21 }
 0xda5   :  { %v847_v5 = vpop.permute.xlu1 %846 }
 0xda6   :  { %v1764_v6 = vadd.f32 %v847_v5, %v839_v4 }
 0xda8   :  { %1430 = vtanh.f32 %v1764_v6 }
 0xdae   :  { %v1431_v7 = vpop.eup %1430 }
 0xdaf   :  { %852 = vrot.lane.b32.xlu0 %v1431_v7, %s1465_s18 }
 0xdbe   :  { %v781_v63 = vpop.permute.xlu0 %780 }
 0xdbf   :  { %v1769_v61 = vadd.f32 %v781_v63, %v773_v9 }
 0xdc1   :  { %1432 = vtanh.f32 %v1769_v61 }
 0xdc7   :  { %v1433_v11 = vpop.eup %1432 }
 0xdc8   :  { %786 = vrot.lane.b32.xlu2 %v1433_v11, %s1465_s18 }
 0xe21   :  { %v853_v48 = vpop.permute.xlu0 %852 }
 0xe22   :  { %v855_v0 = vmul.f32 %v853_v48, %v838_v55  ;;  %v787_v12 = vpop.permute.xlu2 %786 }
 0xe23   :  { %v1773_v13 = vmul.f32 %v787_v12, %v772_v57 }
 0xe24   :  { %v926_v14 = vpack.c.bf16 %v855_v0, %v855_v0  ;;  %857 = vrot.lane.b32.xlu1 %v855_v0, %s1466_s21 }
 0xe25   :  { %860 = vrot.lane.b32.xlu2 %v1773_v13, %s1465_s18 }
 0xe26   :  { %928 = vrot.lane.b32.xlu0 %v926_v14, %s1466_s21 }
 0xe7f   :  { %v861_v40 = vpop.permute.xlu2 %860 }
 0xe96   :  { %v858_v15 = vpop.permute.xlu1 %857 }
 0xe97   :  { %v863_v1 = vsel %vm111_vm1, %v858_v15, %v861_v40 }
 0xe98   :  { %v864_v16 = vpack.c.bf16 %v863_v1, %v863_v1  ;;  %v929_v17 = vpop.permute.xlu0 %928 }
 0xe99   :  { %1323 = vmatmul.msk.bf16.vlgmr.msrb.gmra.mxu1 %vm111_vm1, %v929_v17 }
 0xe9a   :  { %1320 = vmatmul.msk.bf16.vlgmr.msrb.gmra.mxu0 %vm209_vm9, %v864_v16 }
 0xf16   :  { %v942_v18 = vpop.f32.mrf.mxu1 }
 0xf17   :  { %v946_v19 = vadd.f32 %v942_v18, %v925_v3  ;;  %v877_v20 = vpop.f32.mrf.mxu0 }
 0xf18   :  { %v878_v21 = vadd.f32 %v1625_v58, %v877_v20  ;;  %v1055_v20 = vld [vmem:[#allocation2 + $0xe] sm:$0x3] }
 0xf19   :  { %v1324_v42 = vmul.f32 -1.442695, %v946_v19 }
 0xf1a   :  { %v1321_v22 = vmul.f32 -1.442695, %v878_v21 }
 0xf1b   :  { %1434 = vpow2.f32 %v1324_v42 }
 0xf1c   :  { %1436 = vpow2.f32 %v1321_v22 }
 0xf1e   :  { %v944_v43 = vpop.f32.mrf.mxu1 }
 0xf1f   :  { %v879_v44 = vpop.f32.mrf.mxu0  ;;  %v1813_v43 = vld [vmem:[%s1902_s5 + $0x1] ss:$0 sm:$0xff] }
 0xf21   :  { %v1435_v50 = vpop.eup %1434 }
 0xf22   :  { %v1437_v23 = vpop.eup %1436  ;;  %v950_v24 = vadd.f32 1.0, %v1435_v50 }
 0xf23   :  { %v884_v25 = vadd.f32 1.0, %v1437_v23 }
 0xf24   :  { %1438 = vrcp.f32 %v950_v24  ;;  %v962_v33 = vand.u32 2147483648, %v950_v24  ;;  %v960_v34 = vand.u32 2147483647, %v950_v24  ;;  %vm956_vm2 = vweird.f32 %v950_v24 }
 0xf25   :  { %1440 = vrcp.f32 %v884_v25  ;;  %v896_v35 = vand.u32 2147483648, %v884_v25  ;;  %v894_v37 = vand.u32 2147483647, %v884_v25  ;;  %vm890_vm4 = vweird.f32 %v884_v25 }
 0xf26   :  { %v963_v39 = vor.u32 1.1754944e-38, %v962_v33  ;;  %vm961_vm5 = vcmp.eq.f32.partialorder %v960_v34, 8.507059e+37 }
 0xf27   :  { %v897_v46 = vor.u32 1.1754944e-38, %v896_v35  ;;  %vm895_vm7 = vcmp.eq.f32.partialorder %v894_v37, 8.507059e+37 }
 0xf2a   :  { %v1439_v26 = vpop.eup %1438 }
 0xf2b   :  { %v1441_v27 = vpop.eup %1440  ;;  %v952_v28 = vmul.f32 %v1439_v26, %v950_v24  ;;  %vm957_vm14 = vweird.f32 %v1439_v26 }
 0xf2c   :  { %v886_v29 = vmul.f32 %v1441_v27, %v884_v25  ;;  %vm891_vm15 = vweird.f32 %v1441_v27  ;;  %vm958_vm3 = vmor %vm956_vm2, %vm957_vm14 }
 0xf2d   :  { %v953_v30 = vsub.f32 1.0, %v952_v28  ;;  %vm892_vm6 = vmor %vm890_vm4, %vm891_vm15  ;;  %vm273_vm4 = vcmask 254976  }
 0xf2e   :  { %v887_v32 = vsub.f32 1.0, %v886_v29 }
 0xf2f   :  { %v954_v58 = vmul.f32 %v1439_v26, %v953_v30 }
 0xf30   :  { %v888_v36 = vmul.f32 %v1441_v27, %v887_v32 }
 0xf31   :  { %v955_v38 = vadd.f32 %v1439_v26, %v954_v58 }
 0xf32   :  { %v889_v41 = vadd.f32 %v1441_v27, %v888_v36 }
 0xf33   :  { %v959_v45 = vsel %vm958_vm3, %v1439_v26, %v955_v38 }
 0xf34   :  { %v964_v47 = vsel %vm961_vm5, %v963_v39, %v959_v45  ;;  %v893_v49 = vsel %vm892_vm6, %v1441_v27, %v889_v41 }
 0xf35   :  { %v966_v51 = vmul.f32 2.0, %v964_v47  ;;  %v898_v53 = vsel %vm895_vm7, %v897_v46, %v893_v49 }
 0xf36   :  { %v900_v54 = vmul.f32 2.0, %v898_v53 }
 0xf37   :  { %v1325_v55 = vadd.f32 -1.0, %v966_v51 }
 0xf38   :  { %v1322_v57 = vadd.f32 -1.0, %v900_v54 }
 0xf39   :  { %v968_v59 = vsel %vm1550_vm8, %v1325_v55, %v964_v47 }
 0xf3a   :  { %971 = vrot.lane.b32.xlu2 %v968_v59, %s1465_s18  ;;  %v902_v60 = vsel %vm1550_vm8, %v1322_v57, %v898_v53  ;;  %v969_v7 = vmul.f32 %v968_v59, %v1764_v6 }
 0xf3b   :  { %905 = vrot.lane.b32.xlu1 %v902_v60, %s1465_s18  ;;  %v903_v48 = vmul.f32 %v902_v60, %v1769_v61 }
 0xf94   :  { %v972_v62 = vpop.permute.xlu2 %971 }
 0xf95   :  { %v974_v52 = vmul.f32 %v972_v62, %v968_v59 }
 0xf97   :  { %976 = vrot.lane.b32.xlu1 %v974_v52, %s1466_s21 }
 0xfad   :  { %v906_v4 = vpop.permute.xlu1 %905 }
 0xfae   :  { %v908_v5 = vmul.f32 %v906_v4, %v902_v60 }
 0xfb0   :  { %910 = vrot.lane.b32.xlu0 %v908_v5, %s1466_s21 }
0x1009   :  { %v977_v9 = vpop.permute.xlu1 %976 }
0x100a   :  { %v1792_v63 = vadd.f32 %v977_v9, %v969_v7 }
0x100c   :  { %1442 = vtanh.f32 %v1792_v63 }
0x1012   :  { %v1443_v11 = vpop.eup %1442 }
0x1013   :  { %982 = vrot.lane.b32.xlu0 %v1443_v11, %s1465_s18 }
0x1022   :  { %v911_v0 = vpop.permute.xlu0 %910 }
0x1023   :  { %v1797_v12 = vadd.f32 %v911_v0, %v903_v48 }
0x1025   :  { %1444 = vtanh.f32 %v1797_v12 }
0x102b   :  { %v1445_v14 = vpop.eup %1444 }
0x102c   :  { %916 = vrot.lane.b32.xlu2 %v1445_v14, %s1465_s18 }
0x1085   :  { %v983_v40 = vpop.permute.xlu0 %982 }
0x1086   :  { %v985_v6 = vmul.f32 %v983_v40, %v968_v59  ;;  %v917_v15 = vpop.permute.xlu2 %916 }
0x1087   :  { %v1801_v1 = vmul.f32 %v917_v15, %v902_v60 }
0x1088   :  { %v1056_v16 = vpack.c.bf16 %v985_v6, %v985_v6  ;;  %987 = vrot.lane.b32.xlu1 %v985_v6, %s1466_s21 }
0x1089   :  { %990 = vrot.lane.b32.xlu2 %v1801_v1, %s1465_s18 }
0x108a   :  { %1058 = vrot.lane.b32.xlu0 %v1056_v16, %s1466_s21 }
0x10e3   :  { %v991_v61 = vpop.permute.xlu2 %990 }
0x10fa   :  { %v988_v17 = vpop.permute.xlu1 %987 }
0x10fb   :  { %v993_v3 = vsel %vm111_vm1, %v988_v17, %v991_v61 }
0x10fc   :  { %v994_v18 = vpack.c.bf16 %v993_v3, %v993_v3  ;;  %v1059_v19 = vpop.permute.xlu0 %1058 }
0x10fd   :  { %1329 = vmatmul.msk.bf16.vlgmr.msrb.gmra.mxu2 %vm111_vm1, %v1059_v19 }
0x10fe   :  { %1326 = vmatmul.msk.bf16.vlgmr.msrb.gmra.mxu3 %vm209_vm9, %v994_v18 }
0x1180   :  { %v1072_v21 = vpop.f32.mrf.mxu2 }
0x1181   :  { %v1076_v42 = vadd.f32 %v1072_v21, %v1055_v20  ;;  %v1007_v22 = vpop.f32.mrf.mxu3 }
0x1182   :  { %v1008_v44 = vadd.f32 %v1813_v43, %v1007_v22 }
0x1183   :  { %v1330_v50 = vmul.f32 -1.442695, %v1076_v42 }
0x1184   :  { %v1327_v23 = vmul.f32 -1.442695, %v1008_v44 }
0x1185   :  { %1446 = vpow2.f32 %v1330_v50 }
0x1186   :  { %1448 = vpow2.f32 %v1327_v23 }
0x1188   :  { %v1074_v24 = vpop.f32.mrf.mxu2 }
0x1189   :  { %v1009_v25 = vpop.f32.mrf.mxu3 }
0x118b   :  { %v1447_v26 = vpop.eup %1446 }
0x118c   :  { %v1449_v27 = vpop.eup %1448  ;;  %v1080_v28 = vadd.f32 1.0, %v1447_v26 }
0x118d   :  { %v1014_v29 = vadd.f32 1.0, %v1449_v27 }
0x118e   :  { %1450 = vrcp.f32 %v1080_v28  ;;  %v1092_v36 = vand.u32 2147483648, %v1080_v28  ;;  %v1090_v38 = vand.u32 2147483647, %v1080_v28  ;;  %vm1086_vm12 = vweird.f32 %v1080_v28 }
0x118f   :  { %1452 = vrcp.f32 %v1014_v29  ;;  %v1026_v39 = vand.u32 2147483648, %v1014_v29  ;;  %v1024_v45 = vand.u32 2147483647, %v1014_v29  ;;  %vm1020_vm14 = vweird.f32 %v1014_v29 }
0x1190   :  { %v1093_v47 = vor.u32 1.1754944e-38, %v1092_v36  ;;  %vm1091_vm15 = vcmp.eq.f32.partialorder %v1090_v38, 8.507059e+37 }
0x1191   :  { %v1027_v53 = vor.u32 1.1754944e-38, %v1026_v39  ;;  %vm1025_vm3 = vcmp.eq.f32.partialorder %v1024_v45, 8.507059e+37 }
0x1194   :  { %v1451_v30 = vpop.eup %1450 }
0x1195   :  { %v1453_v32 = vpop.eup %1452  ;;  %v1082_v33 = vmul.f32 %v1451_v30, %v1080_v28  ;;  %vm1087_vm10 = vweird.f32 %v1451_v30 }
0x1196   :  { %v1016_v58 = vmul.f32 %v1453_v32, %v1014_v29  ;;  %vm1021_vm11 = vweird.f32 %v1453_v32  ;;  %vm1088_vm13 = vmor %vm1086_vm12, %vm1087_vm10 }
0x1197   :  { %v1083_v34 = vsub.f32 1.0, %v1082_v33  ;;  %vm1022_vm2 = vmor %vm1020_vm14, %vm1021_vm11 }
0x1198   :  { %v1017_v35 = vsub.f32 1.0, %v1016_v58 }
0x1199   :  { %v1084_v37 = vmul.f32 %v1451_v30, %v1083_v34 }
0x119a   :  { %v1018_v41 = vmul.f32 %v1453_v32, %v1017_v35 }
0x119b   :  { %v1085_v46 = vadd.f32 %v1451_v30, %v1084_v37 }
0x119c   :  { %v1019_v49 = vadd.f32 %v1453_v32, %v1018_v41 }
0x119d   :  { %v1089_v51 = vsel %vm1088_vm13, %v1451_v30, %v1085_v46 }
0x119e   :  { %v1094_v54 = vsel %vm1091_vm15, %v1093_v47, %v1089_v51  ;;  %v1023_v55 = vsel %vm1022_vm2, %v1453_v32, %v1019_v49 }
0x119f   :  { %v1096_v57 = vmul.f32 2.0, %v1094_v54  ;;  %v1028_v59 = vsel %vm1025_vm3, %v1027_v53, %v1023_v55 }
0x11a0   :  { %v1030_v60 = vmul.f32 2.0, %v1028_v59 }
0x11a1   :  { %v1331_v62 = vadd.f32 -1.0, %v1096_v57  ;;  %v1355_v57 = vld [vmem:[%s1905_s6] sm:$0xff] }
0x11a2   :  { %v1328_v52 = vadd.f32 -1.0, %v1030_v60 }
0x11a3   :  { %v1098_v4 = vsel %vm1550_vm8, %v1331_v62, %v1094_v54 }
0x11a4   :  { %1101 = vrot.lane.b32.xlu2 %v1098_v4, %s1465_s18  ;;  %v1032_v5 = vsel %vm1550_vm8, %v1328_v52, %v1028_v59  ;;  %v1099_v0 = vmul.f32 %v1098_v4, %v1792_v63 }
0x11a5   :  { %1035 = vrot.lane.b32.xlu1 %v1032_v5, %s1465_s18  ;;  %v1033_v15 = vmul.f32 %v1032_v5, %v1797_v12 }
0x11fe   :  { %v1102_v7 = vpop.permute.xlu2 %1101 }
0x11ff   :  { %v1104_v9 = vmul.f32 %v1102_v7, %v1098_v4 }
0x1201   :  { %1106 = vrot.lane.b32.xlu1 %v1104_v9, %s1466_s21 }
0x1217   :  { %v1036_v11 = vpop.permute.xlu1 %1035 }
0x1218   :  { %v1038_v48 = vmul.f32 %v1036_v11, %v1032_v5 }
0x121a   :  { %1040 = vrot.lane.b32.xlu0 %v1038_v48, %s1466_s21 }
0x1273   :  { %v1107_v14 = vpop.permute.xlu1 %1106 }
0x1274   :  { %v1825_v40 = vadd.f32 %v1107_v14, %v1099_v0 }
0x1276   :  { %1454 = vtanh.f32 %v1825_v40 }
0x127c   :  { %v1455_v6 = vpop.eup %1454 }
0x127d   :  { %1112 = vrot.lane.b32.xlu0 %v1455_v6, %s1465_s18 }
0x128c   :  { %v1041_v16 = vpop.permute.xlu0 %1040 }
0x128d   :  { %v1043_v61 = vadd.f32 %v1041_v16, %v1033_v15 }
0x128f   :  { %1456 = vtanh.f32 %v1043_v61 }
0x1295   :  { %v1457_v17 = vpop.eup %1456 }
0x1296   :  { %1046 = vrot.lane.b32.xlu2 %v1457_v17, %s1465_s18 }
0x12ef   :  { %v1113_v3 = vpop.permute.xlu0 %1112 }
0x12f0   :  { %v1115_v18 = vmul.f32 %v1113_v3, %v1098_v4  ;;  %v1047_v19 = vpop.permute.xlu2 %1046  ;;  %v1367_v4 = vld [vmem:[%s1906_s7] ss:$0 sm:$0xff] }
0x12f1   :  { %v1049_v63 = vmul.f32 %v1047_v19, %v1032_v5 }
0x12f2   :  { %1117 = vrot.lane.b32.xlu1 %v1115_v18, %s1466_s21 }
0x12f3   :  { %1120 = vrot.lane.b32.xlu2 %v1049_v63, %s1465_s18 }
0x134d   :  { %v1121_v20 = vpop.permute.xlu2 %1120 }
0x1364   :  { %v1118_v21 = vpop.permute.xlu1 %1117 }
0x1365   :  { %v1123_v42 = vsel %vm111_vm1, %v1118_v21, %v1121_v20  ;;  %1185 = vst.msk [vmem:[%s1904_s9] sm:$0x3] %vm273_vm4, %v1118_v21 }
0x1366   :  { %v1124_v12 = vpack.c.bf16 %v1123_v42, %v1123_v42 }
0x1368   :  { %1332 = vmatmul.msk.bf16.vlgmr.msra.gmra.mxu0 %vm209_vm9, %v1124_v12 }
0x13e5   :  { %v1137_v22 = vpop.f32.mrf.mxu0 }
0x13e6   :  { %v1138_v44 = vadd.f32 %v1813_v43, %v1137_v22 }
0x13e8   :  { %v1333_v50 = vmul.f32 -1.442695, %v1138_v44 }
0x13ea   :  { %1458 = vpow2.f32 %v1333_v50 }
0x13ed   :  { %v1139_v23 = vpop.f32.mrf.mxu0 }
0x13f0   :  { %v1459_v24 = vpop.eup %1458 }
0x13f1   :  { %v1144_v25 = vadd.f32 1.0, %v1459_v24 }
0x13f3   :  { %1460 = vrcp.f32 %v1144_v25  ;;  %v1156_v29 = vand.u32 2147483648, %v1144_v25  ;;  %v1154_v32 = vand.u32 2147483647, %v1144_v25  ;;  %vm1150_vm6 = vweird.f32 %v1144_v25 }
0x13f5   :  { %v1157_v58 = vor.u32 1.1754944e-38, %v1156_v29  ;;  %vm1155_vm9 = vcmp.eq.f32.partialorder %v1154_v32, 8.507059e+37 }
0x13f9   :  { %v1461_v26 = vpop.eup %1460 }
0x13fa   :  { %v1146_v27 = vmul.f32 %v1461_v26, %v1144_v25  ;;  %vm1151_vm5 = vweird.f32 %v1461_v26 }
0x13fb   :  { %vm1152_vm7 = vmor %vm1150_vm6, %vm1151_vm5 }
0x13fc   :  { %v1147_v28 = vsub.f32 1.0, %v1146_v27 }
0x13fe   :  { %v1148_v30 = vmul.f32 %v1461_v26, %v1147_v28 }
0x1400   :  { %v1149_v33 = vadd.f32 %v1461_v26, %v1148_v30 }
0x1402   :  { %v1153_v34 = vsel %vm1152_vm7, %v1461_v26, %v1149_v33 }
0x1403   :  { %v1158_v43 = vsel %vm1155_vm9, %v1157_v58, %v1153_v34 }
0x1404   :  { %v1160_v35 = vmul.f32 2.0, %v1158_v43 }
0x1406   :  { %v1334_v36 = vadd.f32 -1.0, %v1160_v35 }
0x1408   :  { %v1162_v37 = vsel %vm1550_vm8, %v1334_v36, %v1158_v43 }
0x1409   :  { %1165 = vrot.lane.b32.xlu0 %v1162_v37, %s1465_s18 }
0x1411   :  { %270 = vrot.lane.b32.xlu0 %v1645_v56, %s1466_s21 }
0x1419   :  { %661 = vrot.lane.b32.xlu0 %v1745_v10, %s1466_s21  ;;  %v1163_v10 = vmul.f32 %v1162_v37, %v1043_v61 }
0x1421   :  { %1051 = vrot.lane.b32.xlu0 %v1049_v63, %s1466_s21 }
0x147b   :  { %v1166_v38 = vpop.permute.xlu0 %1165 }
0x147c   :  { %v1168_v39 = vmul.f32 %v1166_v38, %v1162_v37 }
0x147e   :  { %1170 = vrot.lane.b32.xlu1 %v1168_v39, %s1466_s21 }
0x1483   :  { %v271_v41 = vpop.permute.xlu0 %270 }
0x1484   :  { %274 = vst.msk [vmem:[#allocation3] sm:$0x3] %vm273_vm4, %v271_v41 }
0x1486   :  { %401 = vrot.lane.b32.xlu1 %v1679_v2, %s1466_s21 }
0x148b   :  { %v662_v31 = vpop.permute.xlu0 %661 }
0x148c   :  { %664 = vst.msk [vmem:[#allocation3 + $0x6] sm:$0x3] %vm273_vm4, %v662_v31 }
0x148e   :  { %791 = vrot.lane.b32.xlu1 %v1773_v13, %s1466_s21  ;;  %v1356_v13 = vld [vmem:[%s1905_s6 + $0x8] sm:$0xff] }
0x148f   :  { %1232 = vmatpush.bf16.msra.mxu1 %v1356_v13 }
0x1493   :  { %v1052_v56 = vpop.permute.xlu0 %1051  ;;  %1233 = vmatpush.bf16.msra.mxu1 %v1355_v57 }
0x1494   :  { %1054 = vst.msk [vmem:[#allocation3 + $0xc] sm:$0x3] %vm273_vm4, %v1052_v56 }
0x14f0   :  { %v1171_v45 = vpop.permute.xlu1 %1170 }
0x14f1   :  { %v1173_v46 = vadd.f32 %v1171_v45, %v1163_v10 }
0x14f3   :  { %1462 = vtanh.f32 %v1173_v46  ;;  %1195 = vrot.lane.b32.xlu0 %v1173_v46, %s1467_s16 }
0x14f8   :  { %v402_v47 = vpop.permute.xlu1 %401 }
0x14f9   :  { %v1463_v49 = vpop.eup %1462  ;;  %404 = vst.msk [vmem:[#allocation3 + $0x2] sm:$0x3] %vm273_vm4, %v402_v47 }
0x14fa   :  { %1176 = vrot.lane.b32.xlu2 %v1463_v49, %s1465_s18 }
0x1500   :  { %v792_v2 = vpop.permute.xlu1 %791 }
0x1501   :  { %794 = vst.msk [vmem:[#allocation3 + $0x8] sm:$0x3] %vm273_vm4, %v792_v2 }
0x1502   :  { %531 = vrot.lane.b32.xlu2 %v1713_v8, %s1466_s21 }
0x150a   :  { %921 = vrot.lane.b32.xlu2 %v1801_v1, %s1466_s21 }
0x1512   :  { %1187 = vrot.lane.b32.xlu2 %v1825_v40, %s1467_s16 }
0x1554   :  { %v1177_v51 = vpop.permute.xlu2 %1176 }
0x1555   :  { %v1179_v53 = vmul.f32 %v1177_v51, %v1162_v37 }
0x1557   :  { %1181 = vrot.lane.b32.xlu1 %v1179_v53, %s1466_s21 }
0x155c   :  { %v532_v54 = vpop.permute.xlu2 %531 }
0x155d   :  { %534 = vst.msk [vmem:[#allocation3 + $0x4] sm:$0x3] %vm273_vm4, %v532_v54 }
0x1564   :  { %v922_v55 = vpop.permute.xlu2 %921  ;;  %v1200_v60 = vld [vmem:[#allocation3] sm:$0xff] }
0x1565   :  { %924 = vst.msk [vmem:[#allocation3 + $0xa] sm:$0x3] %vm273_vm4, %v922_v55  ;;  %v1196_v8 = vpop.permute.xlu0 %1195 }
0x1566   :  { %1337 = vst.msk [vmem:[%s1904_s9 + $0x6] sm:$0x3] %vm273_vm4, %v1196_v8 }
0x156c   :  { %v1188_v1 = vpop.permute.xlu2 %1187 }
0x156d   :  { %1335 = vst.msk [vmem:[%s1904_s9 + $0x4] sm:$0x3] %vm273_vm4, %v1188_v1 }
0x15c9   :  { %v1182_v59 = vpop.permute.xlu1 %1181 }
0x15ca   :  { %1184 = vst.msk [vmem:[#allocation3 + $0xe] sm:$0x3] %vm273_vm4, %v1182_v59 }
0x15cb   :  { %1336 = vst.msk [vmem:[%s1904_s9 + $0x2] sm:$0x3] %vm273_vm4, %v1182_v59 }
0x15d1   :  { %v1201_v62 = vld [vmem:[#allocation3 + $0x8] sm:$0xff] }
0x15d2   :  { %v1202_v52 = vpack.c.bf16 %v1201_v62, %v1200_v60 }
0x15d4   :  { %1346 = vmatmul.msk.bf16.vlgmr.msra.gmra.mxu1 %vm111_vm1, %v1202_v52 }
0x1651   :  { %v1235_v5 = vpop.f32.mrf.mxu1 }
0x1652   :  { %v1236_v7 = vadd.f32 %v1367_v4, %v1235_v5 }
0x1654   :  { %1240 = vst.msk [vmem:[%s1907_s8] sm:$0xff] %vm51_vm0, %v1236_v7 }
0x1659   :  { %v1237_v9 = vpop.f32.mrf.mxu1 }
0x165a   :  { %v1238_v11 = vadd.f32 %v1367_v4, %v1237_v9 }
0x165c   :  { %1241 = vst.msk [vmem:[%s1907_s8 + $0x8] sm:$0xff] %vm51_vm0, %v1238_v11 }

</bundles_post_ra>
